<compile_context>
chip_gen: v5e
topology: v5e:2x2
jax: 0.10.0
libtpu: 0.0.40
codegen_flags: <defaults>
</compile_context>

<pallas_src>
import functools

import jax
import jax.numpy as jnp
from jax.experimental import pallas as pl
from jax.experimental.pallas import tpu as pltpu


def our_model_kernel(x_ref,
                     w1_ref, b1_ref, w2_ref, b2_ref,
                     wir_ref, wiz_ref, win_ref,
                     br_ref, bz_ref, bni_ref, bnh_ref,
                     whr_ref, whz_ref, whn_ref,
                     h0_ref,
                     o1w_ref, o1b_ref, o2w_ref, o2b_ref,
                     o3w_ref, o3b_ref, o4w_ref, o4b_ref,
                     out_ref, *, hidden, seq_l, stocks_len):
    f32 = jnp.float32
    bf16 = jnp.bfloat16
    H = hidden

    # ---- Load every weight / bias once; tiny footprint, stays resident across the loop.
    w1 = w1_ref[...]; b1 = b1_ref[...]
    w2 = w2_ref[...]; b2 = b2_ref[...]
    wir = wir_ref[...]; wiz = wiz_ref[...]; win = win_ref[...]
    br = br_ref[...]; bz = bz_ref[...]; bni = bni_ref[...]
    whr = whr_ref[...]; whz = whz_ref[...]; whn = whn_ref[...]
    # n-gate hidden bias sits inside the r* product -> keep separate; broadcast once, not per step.
    bnh = jnp.broadcast_to(bnh_ref[...], (stocks_len, H))

    # ---- Hoisted, h-independent input path, batched over all T = seq_l*stocks_len rows.
    # in_nn: Linear->ReLU->Linear->ReLU ; the third Linear and the GRU input projection are
    # pre-folded into wir/wiz/win (and br/bz/bni) by the wrapper.
    x = x_ref[...]                                                        # (T, in_ch) bf16
    a = jnp.maximum(jnp.dot(x, w1, preferred_element_type=f32) + b1, 0.0)
    a = jnp.maximum(jnp.dot(a.astype(bf16), w2, preferred_element_type=f32) + b2, 0.0)
    a = a.astype(bf16)
    gi_r = jnp.dot(a, wir, preferred_element_type=f32) + br               # (T, H)
    gi_z = jnp.dot(a, wiz, preferred_element_type=f32) + bz
    gi_n = jnp.dot(a, win, preferred_element_type=f32) + bni

    # ---- Serial GRU recurrence: only the h-dependent work remains per step.
    h = jnp.broadcast_to(h0_ref[...], (stocks_len, H)).astype(f32)
    for i in range(seq_l):          # seq_l is small & static: full unroll for scheduler visibility
        s = i * stocks_len
        hb = h.astype(bf16)
        gh_r = jnp.dot(hb, whr, preferred_element_type=f32)
        gh_z = jnp.dot(hb, whz, preferred_element_type=f32)
        gh_n = jnp.dot(hb, whn, preferred_element_type=f32) + bnh
        r = jax.nn.sigmoid(gi_r[s:s + stocks_len] + gh_r)
        z = jax.nn.sigmoid(gi_z[s:s + stocks_len] + gh_z)
        n = jnp.tanh(gi_n[s:s + stocks_len] + r * gh_n)
        h = (1.0 - z) * n + z * h

    # ---- out_nn: (Linear -> ReLU) x3 -> Linear (lane-dense padded), then sigmoid.
    y = jnp.maximum(
        jnp.dot(h.astype(bf16), o1w_ref[...], preferred_element_type=f32) + o1b_ref[...], 0.0)
    y = jnp.maximum(
        jnp.dot(y.astype(bf16), o2w_ref[...], preferred_element_type=f32) + o2b_ref[...], 0.0)
    y = jnp.maximum(
        jnp.dot(y.astype(bf16), o3w_ref[...], preferred_element_type=f32) + o3b_ref[...], 0.0)
    y = jnp.dot(y.astype(bf16), o4w_ref[...], preferred_element_type=f32) + o4b_ref[...]
    out_ref[...] = jax.nn.sigmoid(y)


def our_model_forward(inputs, edge_index, params, *, hidden):
    # edge_index only drives branches whose results never reach the returned tensor.
    del edge_index
    seq_l, stocks_len, in_ch = inputs.shape
    H = hidden
    out_ch = params["o4_w"].shape[1]
    n_pad = ((out_ch + 127) // 128) * 128
    f32, bf16 = jnp.float32, jnp.bfloat16

    # Fold the third in_nn Linear into the GRU input projection (no nonlinearity in between),
    # split the packed GRU weights gate-major, and pre-combine biases that never meet the
    # r-gate product.
    wih_fold = params["w3"] @ params["gru_wih"]                          # (H, 3H)
    bih_fold = params["b3"] @ params["gru_wih"] + params["gru_bih"]      # (1, 3H)
    whh = params["gru_whh"]
    bhh = params["gru_bhh"]

    wir, wiz, win = wih_fold[:, :H], wih_fold[:, H:2 * H], wih_fold[:, 2 * H:]
    whr, whz, whn = whh[:, :H], whh[:, H:2 * H], whh[:, 2 * H:]
    br = bih_fold[:, :H] + bhh[:, :H]               # r-gate: input + hidden bias
    bz = bih_fold[:, H:2 * H] + bhh[:, H:2 * H]     # z-gate: input + hidden bias
    bni = bih_fold[:, 2 * H:]                       # n-gate input bias (outside r*)
    bnh = bhh[:, 2 * H:]                            # n-gate hidden bias (inside r*)

    # Lane-dense final layer: pad out_channel up to a multiple of 128, slice afterwards.
    o4w = jnp.zeros((H, n_pad), f32).at[:, :out_ch].set(params["o4_w"])
    o4b = jnp.zeros((1, n_pad), f32).at[:, :out_ch].set(params["o4_b"])

    cast = lambda a: a.astype(bf16)     # bf16 MXU operands, f32 accumulation
    x2d = cast(inputs.reshape(seq_l * stocks_len, in_ch))

    ordered = [
        x2d,
        cast(params["w1"]), params["b1"], cast(params["w2"]), params["b2"],
        cast(wir), cast(wiz), cast(win), br, bz, bni, bnh,
        cast(whr), cast(whz), cast(whn),
        params["h_input_start"],
        cast(params["o1_w"]), params["o1_b"], cast(params["o2_w"]), params["o2_b"],
        cast(params["o3_w"]), params["o3_b"], cast(o4w), o4b,
    ]

    kernel = functools.partial(
        our_model_kernel, hidden=H, seq_l=seq_l, stocks_len=stocks_len)

    vmem = pl.BlockSpec(memory_space=pltpu.MemorySpace.VMEM)
    out = pl.pallas_call(
        kernel,
        out_shape=jax.ShapeDtypeStruct((stocks_len, n_pad), f32),
        in_specs=[vmem] * len(ordered),
        out_specs=vmem,
    )(*ordered)
    return jnp.squeeze(out[:, :out_ch])     # matches x.squeeze() in Our_Model.forward


def init_params(key, in_ch, hidden, out_ch):
    keys = jax.random.split(key, 19)
    H = hidden

    def u(k, shape, scale=0.1):
        return jax.random.uniform(k, shape, jnp.float32, -scale, scale)

    return {
        # in_nn (input path of rnn_gccn_hidden's live branch: in_ch -> H -> H -> H)
        "w1": u(keys[0], (in_ch, H)), "b1": u(keys[1], (1, H)),
        "w2": u(keys[2], (H, H)),     "b2": u(keys[3], (1, H)),
        "w3": u(keys[4], (H, H)),     "b3": u(keys[5], (1, H)),
        # local_rnn_input GRUCell of rnn_gccn_hidden: input dim H, hidden dim H
        "gru_wih": u(keys[6], (H, 3 * H)), "gru_whh": u(keys[7], (H, 3 * H)),
        "gru_bih": u(keys[8], (1, 3 * H)), "gru_bhh": u(keys[9], (1, 3 * H)),
        "h_input_start": u(keys[10], (1, H)),
        # out_nn: H -> 4H -> 2H -> H -> out_ch
        "o1_w": u(keys[11], (H, 4 * H)),     "o1_b": u(keys[12], (1, 4 * H)),
        "o2_w": u(keys[13], (4 * H, 2 * H)), "o2_b": u(keys[14], (1, 2 * H)),
        "o3_w": u(keys[15], (2 * H, H)),     "o3_b": u(keys[16], (1, H)),
        "o4_w": u(keys[17], (H, out_ch)),    "o4_b": u(keys[18], (1, out_ch)),
    }


def reference_forward(inputs, params, hidden):
    # Pure-JAX f32 reference of the live dataflow (unfolded, packed GRU weights).
    H = hidden
    seq_l, stocks_len, _ = inputs.shape
    h = jnp.broadcast_to(params["h_input_start"], (stocks_len, H))
    for i in range(seq_l):
        a = jnp.maximum(inputs[i] @ params["w1"] + params["b1"], 0.0)
        a = jnp.maximum(a @ params["w2"] + params["b2"], 0.0)
        a = a @ params["w3"] + params["b3"]
        gi = a @ params["gru_wih"] + params["gru_bih"]
        gh = h @ params["gru_whh"] + params["gru_bhh"]
        r = jax.nn.sigmoid(gi[:, :H] + gh[:, :H])
        z = jax.nn.sigmoid(gi[:, H:2 * H] + gh[:, H:2 * H])
        n = jnp.tanh(gi[:, 2 * H:] + r * gh[:, 2 * H:])
        h = (1.0 - z) * n + z * h
    y = jnp.maximum(h @ params["o1_w"] + params["o1_b"], 0.0)
    y = jnp.maximum(y @ params["o2_w"] + params["o2_b"], 0.0)
    y = jnp.maximum(y @ params["o3_w"] + params["o3_b"], 0.0)
    y = y @ params["o4_w"] + params["o4_b"]
    return jax.nn.sigmoid(jnp.squeeze(y))


if __name__ == "__main__":
    in_ch, hidden, out_ch = 16, 32, 1
    num_stocks, num_news = 4, 3
    batch_size = 2
    seq_l = 8
    stocks_len = batch_size * num_stocks   # 8
    num_edges = 6

    key = jax.random.PRNGKey(0)
    k_in, k_param, k_edge = jax.random.split(key, 3)

    inputs = jax.random.normal(k_in, (seq_l, stocks_len, in_ch), jnp.float32)
    edge_index = jax.random.randint(
        k_edge, (seq_l, 2, num_edges), 0, num_stocks, jnp.int32
    )
    params = init_params(k_param, in_ch, hidden, out_ch)

    out = our_model_forward(inputs, edge_index, params, hidden=hidden)
    out = jax.block_until_ready(out)

    ref = reference_forward(inputs, params, hidden)
    assert out.shape == ref.shape, (out.shape, ref.shape)
    assert float(jnp.max(jnp.abs(out - ref))) < 2e-2   # bf16 MXU operands, f32 accumulate
    print("KERNEL_OK")
</pallas_src>

<mosaic_0001>
module attributes {stable_mosaic.version = 11 : i64} {
  func.func @our_model_kernel(%arg0: memref<64x16xbf16, #tpu.memory_space<vmem>>, %arg1: memref<16x32xbf16, #tpu.memory_space<vmem>>, %arg2: memref<1x32xf32, #tpu.memory_space<vmem>>, %arg3: memref<32x32xbf16, #tpu.memory_space<vmem>>, %arg4: memref<1x32xf32, #tpu.memory_space<vmem>>, %arg5: memref<32x32xbf16, #tpu.memory_space<vmem>>, %arg6: memref<32x32xbf16, #tpu.memory_space<vmem>>, %arg7: memref<32x32xbf16, #tpu.memory_space<vmem>>, %arg8: memref<1x32xf32, #tpu.memory_space<vmem>>, %arg9: memref<1x32xf32, #tpu.memory_space<vmem>>, %arg10: memref<1x32xf32, #tpu.memory_space<vmem>>, %arg11: memref<1x32xf32, #tpu.memory_space<vmem>>, %arg12: memref<32x32xbf16, #tpu.memory_space<vmem>>, %arg13: memref<32x32xbf16, #tpu.memory_space<vmem>>, %arg14: memref<32x32xbf16, #tpu.memory_space<vmem>>, %arg15: memref<1x32xf32, #tpu.memory_space<vmem>>, %arg16: memref<32x128xbf16, #tpu.memory_space<vmem>>, %arg17: memref<1x128xf32, #tpu.memory_space<vmem>>, %arg18: memref<128x64xbf16, #tpu.memory_space<vmem>>, %arg19: memref<1x64xf32, #tpu.memory_space<vmem>>, %arg20: memref<64x32xbf16, #tpu.memory_space<vmem>>, %arg21: memref<1x32xf32, #tpu.memory_space<vmem>>, %arg22: memref<32x128xbf16, #tpu.memory_space<vmem>>, %arg23: memref<1x128xf32, #tpu.memory_space<vmem>>, %arg24: memref<8x128xf32, #tpu.memory_space<vmem>>) attributes {dimension_semantics = [], scalar_prefetch = 0 : i64, scratch_operands = 0 : i64, tpu.core_type = #tpu.core_type<tc>} {
    %c0 = arith.constant 0 : index
    %c0_0 = arith.constant 0 : index
    %0 = vector.load %arg1[%c0, %c0_0] : memref<16x32xbf16, #tpu.memory_space<vmem>>, vector<16x32xbf16>
    %c0_1 = arith.constant 0 : index
    %c0_2 = arith.constant 0 : index
    %1 = vector.load %arg2[%c0_1, %c0_2] : memref<1x32xf32, #tpu.memory_space<vmem>>, vector<1x32xf32>
    %c0_3 = arith.constant 0 : index
    %c0_4 = arith.constant 0 : index
    %2 = vector.load %arg3[%c0_3, %c0_4] : memref<32x32xbf16, #tpu.memory_space<vmem>>, vector<32x32xbf16>
    %c0_5 = arith.constant 0 : index
    %c0_6 = arith.constant 0 : index
    %3 = vector.load %arg4[%c0_5, %c0_6] : memref<1x32xf32, #tpu.memory_space<vmem>>, vector<1x32xf32>
    %c0_7 = arith.constant 0 : index
    %c0_8 = arith.constant 0 : index
    %4 = vector.load %arg5[%c0_7, %c0_8] : memref<32x32xbf16, #tpu.memory_space<vmem>>, vector<32x32xbf16>
    %c0_9 = arith.constant 0 : index
    %c0_10 = arith.constant 0 : index
    %5 = vector.load %arg6[%c0_9, %c0_10] : memref<32x32xbf16, #tpu.memory_space<vmem>>, vector<32x32xbf16>
    %c0_11 = arith.constant 0 : index
    %c0_12 = arith.constant 0 : index
    %6 = vector.load %arg7[%c0_11, %c0_12] : memref<32x32xbf16, #tpu.memory_space<vmem>>, vector<32x32xbf16>
    %c0_13 = arith.constant 0 : index
    %c0_14 = arith.constant 0 : index
    %7 = vector.load %arg8[%c0_13, %c0_14] : memref<1x32xf32, #tpu.memory_space<vmem>>, vector<1x32xf32>
    %c0_15 = arith.constant 0 : index
    %c0_16 = arith.constant 0 : index
    %8 = vector.load %arg9[%c0_15, %c0_16] : memref<1x32xf32, #tpu.memory_space<vmem>>, vector<1x32xf32>
    %c0_17 = arith.constant 0 : index
    %c0_18 = arith.constant 0 : index
    %9 = vector.load %arg10[%c0_17, %c0_18] : memref<1x32xf32, #tpu.memory_space<vmem>>, vector<1x32xf32>
    %c0_19 = arith.constant 0 : index
    %c0_20 = arith.constant 0 : index
    %10 = vector.load %arg12[%c0_19, %c0_20] : memref<32x32xbf16, #tpu.memory_space<vmem>>, vector<32x32xbf16>
    %c0_21 = arith.constant 0 : index
    %c0_22 = arith.constant 0 : index
    %11 = vector.load %arg13[%c0_21, %c0_22] : memref<32x32xbf16, #tpu.memory_space<vmem>>, vector<32x32xbf16>
    %c0_23 = arith.constant 0 : index
    %c0_24 = arith.constant 0 : index
    %12 = vector.load %arg14[%c0_23, %c0_24] : memref<32x32xbf16, #tpu.memory_space<vmem>>, vector<32x32xbf16>
    %c0_25 = arith.constant 0 : index
    %c0_26 = arith.constant 0 : index
    %13 = vector.load %arg11[%c0_25, %c0_26] : memref<1x32xf32, #tpu.memory_space<vmem>>, vector<1x32xf32>
    %14 = vector.shape_cast %13 : vector<1x32xf32> to vector<1x32xf32>
    %15 = vector.broadcast %14 : vector<1x32xf32> to vector<8x32xf32>
    %c0_27 = arith.constant 0 : index
    %c0_28 = arith.constant 0 : index
    %16 = vector.load %arg0[%c0_27, %c0_28] : memref<64x16xbf16, #tpu.memory_space<vmem>>, vector<64x16xbf16>
    %cst = arith.constant dense<0.000000e+00> : vector<64x32xf32>
    %17 = tpu.matmul %16, %0, %cst {dimension_numbers = #tpu.dot_dimension_numbers<[1], [0], [0], [1], [0, 0, 1, 1], [], []>} : vector<64x16xbf16>, vector<16x32xbf16>, vector<64x32xf32> -> vector<64x32xf32>
    %18 = vector.broadcast %1 : vector<1x32xf32> to vector<64x32xf32>
    %19 = arith.addf %17, %18 : vector<64x32xf32>
    %cst_29 = arith.constant 0.000000e+00 : f32
    %20 = vector.broadcast %cst_29 : f32 to vector<64x32xf32>
    %21 = arith.maximumf %19, %20 : vector<64x32xf32>
    %22 = arith.truncf %21 : vector<64x32xf32> to vector<64x32xbf16>
    %cst_30 = arith.constant dense<0.000000e+00> : vector<64x32xf32>
    %23 = tpu.matmul %22, %2, %cst_30 {dimension_numbers = #tpu.dot_dimension_numbers<[1], [0], [0], [1], [0, 0, 1, 1], [], []>} : vector<64x32xbf16>, vector<32x32xbf16>, vector<64x32xf32> -> vector<64x32xf32>
    %24 = vector.broadcast %3 : vector<1x32xf32> to vector<64x32xf32>
    %25 = arith.addf %23, %24 : vector<64x32xf32>
    %cst_31 = arith.constant 0.000000e+00 : f32
    %26 = vector.broadcast %cst_31 : f32 to vector<64x32xf32>
    %27 = arith.maximumf %25, %26 : vector<64x32xf32>
    %28 = arith.truncf %27 : vector<64x32xf32> to vector<64x32xbf16>
    %cst_32 = arith.constant dense<0.000000e+00> : vector<64x32xf32>
    %29 = tpu.matmul %28, %4, %cst_32 {dimension_numbers = #tpu.dot_dimension_numbers<[1], [0], [0], [1], [0, 0, 1, 1], [], []>} : vector<64x32xbf16>, vector<32x32xbf16>, vector<64x32xf32> -> vector<64x32xf32>
    %30 = vector.broadcast %7 : vector<1x32xf32> to vector<64x32xf32>
    %31 = arith.addf %29, %30 : vector<64x32xf32>
    %cst_33 = arith.constant dense<0.000000e+00> : vector<64x32xf32>
    %32 = tpu.matmul %28, %5, %cst_33 {dimension_numbers = #tpu.dot_dimension_numbers<[1], [0], [0], [1], [0, 0, 1, 1], [], []>} : vector<64x32xbf16>, vector<32x32xbf16>, vector<64x32xf32> -> vector<64x32xf32>
    %33 = vector.broadcast %8 : vector<1x32xf32> to vector<64x32xf32>
    %34 = arith.addf %32, %33 : vector<64x32xf32>
    %cst_34 = arith.constant dense<0.000000e+00> : vector<64x32xf32>
    %35 = tpu.matmul %28, %6, %cst_34 {dimension_numbers = #tpu.dot_dimension_numbers<[1], [0], [0], [1], [0, 0, 1, 1], [], []>} : vector<64x32xbf16>, vector<32x32xbf16>, vector<64x32xf32> -> vector<64x32xf32>
    %36 = vector.broadcast %9 : vector<1x32xf32> to vector<64x32xf32>
    %37 = arith.addf %35, %36 : vector<64x32xf32>
    %c0_35 = arith.constant 0 : index
    %c0_36 = arith.constant 0 : index
    %38 = vector.load %arg15[%c0_35, %c0_36] : memref<1x32xf32, #tpu.memory_space<vmem>>, vector<1x32xf32>
    %39 = vector.shape_cast %38 : vector<1x32xf32> to vector<1x32xf32>
    %40 = vector.broadcast %39 : vector<1x32xf32> to vector<8x32xf32>
    %41 = arith.truncf %40 : vector<8x32xf32> to vector<8x32xbf16>
    %cst_37 = arith.constant dense<0.000000e+00> : vector<8x32xf32>
    %42 = tpu.matmul %41, %10, %cst_37 {dimension_numbers = #tpu.dot_dimension_numbers<[1], [0], [0], [1], [0, 0, 1, 1], [], []>} : vector<8x32xbf16>, vector<32x32xbf16>, vector<8x32xf32> -> vector<8x32xf32>
    %cst_38 = arith.constant dense<0.000000e+00> : vector<8x32xf32>
    %43 = tpu.matmul %41, %11, %cst_38 {dimension_numbers = #tpu.dot_dimension_numbers<[1], [0], [0], [1], [0, 0, 1, 1], [], []>} : vector<8x32xbf16>, vector<32x32xbf16>, vector<8x32xf32> -> vector<8x32xf32>
    %cst_39 = arith.constant dense<0.000000e+00> : vector<8x32xf32>
    %44 = tpu.matmul %41, %12, %cst_39 {dimension_numbers = #tpu.dot_dimension_numbers<[1], [0], [0], [1], [0, 0, 1, 1], [], []>} : vector<8x32xbf16>, vector<32x32xbf16>, vector<8x32xf32> -> vector<8x32xf32>
    %45 = arith.addf %44, %15 : vector<8x32xf32>
    %46 = vector.extract_strided_slice %31 {offsets = [0, 0], sizes = [8, 32], strides = [1, 1]} : vector<64x32xf32> to vector<8x32xf32>
    %47 = arith.addf %46, %42 : vector<8x32xf32>
    %48 = arith.negf %47 : vector<8x32xf32>
    %49 = math.exp %48 : vector<8x32xf32>
    %cst_40 = arith.constant 1.000000e+00 : f32
    %50 = vector.broadcast %cst_40 : f32 to vector<8x32xf32>
    %51 = arith.addf %50, %49 : vector<8x32xf32>
    %52 = arith.divf %50, %51 : vector<8x32xf32>
    %53 = vector.extract_strided_slice %34 {offsets = [0, 0], sizes = [8, 32], strides = [1, 1]} : vector<64x32xf32> to vector<8x32xf32>
    %54 = arith.addf %53, %43 : vector<8x32xf32>
    %55 = arith.negf %54 : vector<8x32xf32>
    %56 = math.exp %55 : vector<8x32xf32>
    %cst_41 = arith.constant 1.000000e+00 : f32
    %57 = vector.broadcast %cst_41 : f32 to vector<8x32xf32>
    %58 = arith.addf %57, %56 : vector<8x32xf32>
    %59 = arith.divf %57, %58 : vector<8x32xf32>
    %60 = vector.extract_strided_slice %37 {offsets = [0, 0], sizes = [8, 32], strides = [1, 1]} : vector<64x32xf32> to vector<8x32xf32>
    %61 = arith.mulf %52, %45 : vector<8x32xf32>
    %62 = arith.addf %60, %61 : vector<8x32xf32>
    %63 = math.tanh %62 : vector<8x32xf32>
    %cst_42 = arith.constant 1.000000e+00 : f32
    %64 = vector.broadcast %cst_42 : f32 to vector<8x32xf32>
    %65 = arith.subf %64, %59 : vector<8x32xf32>
    %66 = arith.mulf %65, %63 : vector<8x32xf32>
    %67 = arith.mulf %59, %40 : vector<8x32xf32>
    %68 = arith.addf %66, %67 : vector<8x32xf32>
    %69 = arith.truncf %68 : vector<8x32xf32> to vector<8x32xbf16>
    %cst_43 = arith.constant dense<0.000000e+00> : vector<8x32xf32>
    %70 = tpu.matmul %69, %10, %cst_43 {dimension_numbers = #tpu.dot_dimension_numbers<[1], [0], [0], [1], [0, 0, 1, 1], [], []>} : vector<8x32xbf16>, vector<32x32xbf16>, vector<8x32xf32> -> vector<8x32xf32>
    %cst_44 = arith.constant dense<0.000000e+00> : vector<8x32xf32>
    %71 = tpu.matmul %69, %11, %cst_44 {dimension_numbers = #tpu.dot_dimension_numbers<[1], [0], [0], [1], [0, 0, 1, 1], [], []>} : vector<8x32xbf16>, vector<32x32xbf16>, vector<8x32xf32> -> vector<8x32xf32>
    %cst_45 = arith.constant dense<0.000000e+00> : vector<8x32xf32>
    %72 = tpu.matmul %69, %12, %cst_45 {dimension_numbers = #tpu.dot_dimension_numbers<[1], [0], [0], [1], [0, 0, 1, 1], [], []>} : vector<8x32xbf16>, vector<32x32xbf16>, vector<8x32xf32> -> vector<8x32xf32>
    %73 = arith.addf %72, %15 : vector<8x32xf32>
    %74 = vector.extract_strided_slice %31 {offsets = [8, 0], sizes = [8, 32], strides = [1, 1]} : vector<64x32xf32> to vector<8x32xf32>
    %75 = arith.addf %74, %70 : vector<8x32xf32>
    %76 = arith.negf %75 : vector<8x32xf32>
    %77 = math.exp %76 : vector<8x32xf32>
    %cst_46 = arith.constant 1.000000e+00 : f32
    %78 = vector.broadcast %cst_46 : f32 to vector<8x32xf32>
    %79 = arith.addf %78, %77 : vector<8x32xf32>
    %80 = arith.divf %78, %79 : vector<8x32xf32>
    %81 = vector.extract_strided_slice %34 {offsets = [8, 0], sizes = [8, 32], strides = [1, 1]} : vector<64x32xf32> to vector<8x32xf32>
    %82 = arith.addf %81, %71 : vector<8x32xf32>
    %83 = arith.negf %82 : vector<8x32xf32>
    %84 = math.exp %83 : vector<8x32xf32>
    %cst_47 = arith.constant 1.000000e+00 : f32
    %85 = vector.broadcast %cst_47 : f32 to vector<8x32xf32>
    %86 = arith.addf %85, %84 : vector<8x32xf32>
    %87 = arith.divf %85, %86 : vector<8x32xf32>
    %88 = vector.extract_strided_slice %37 {offsets = [8, 0], sizes = [8, 32], strides = [1, 1]} : vector<64x32xf32> to vector<8x32xf32>
    %89 = arith.mulf %80, %73 : vector<8x32xf32>
    %90 = arith.addf %88, %89 : vector<8x32xf32>
    %91 = math.tanh %90 : vector<8x32xf32>
    %cst_48 = arith.constant 1.000000e+00 : f32
    %92 = vector.broadcast %cst_48 : f32 to vector<8x32xf32>
    %93 = arith.subf %92, %87 : vector<8x32xf32>
    %94 = arith.mulf %93, %91 : vector<8x32xf32>
    %95 = arith.mulf %87, %68 : vector<8x32xf32>
    %96 = arith.addf %94, %95 : vector<8x32xf32>
    %97 = arith.truncf %96 : vector<8x32xf32> to vector<8x32xbf16>
    %cst_49 = arith.constant dense<0.000000e+00> : vector<8x32xf32>
    %98 = tpu.matmul %97, %10, %cst_49 {dimension_numbers = #tpu.dot_dimension_numbers<[1], [0], [0], [1], [0, 0, 1, 1], [], []>} : vector<8x32xbf16>, vector<32x32xbf16>, vector<8x32xf32> -> vector<8x32xf32>
    %cst_50 = arith.constant dense<0.000000e+00> : vector<8x32xf32>
    %99 = tpu.matmul %97, %11, %cst_50 {dimension_numbers = #tpu.dot_dimension_numbers<[1], [0], [0], [1], [0, 0, 1, 1], [], []>} : vector<8x32xbf16>, vector<32x32xbf16>, vector<8x32xf32> -> vector<8x32xf32>
    %cst_51 = arith.constant dense<0.000000e+00> : vector<8x32xf32>
    %100 = tpu.matmul %97, %12, %cst_51 {dimension_numbers = #tpu.dot_dimension_numbers<[1], [0], [0], [1], [0, 0, 1, 1], [], []>} : vector<8x32xbf16>, vector<32x32xbf16>, vector<8x32xf32> -> vector<8x32xf32>
    %101 = arith.addf %100, %15 : vector<8x32xf32>
    %102 = vector.extract_strided_slice %31 {offsets = [16, 0], sizes = [8, 32], strides = [1, 1]} : vector<64x32xf32> to vector<8x32xf32>
    %103 = arith.addf %102, %98 : vector<8x32xf32>
    %104 = arith.negf %103 : vector<8x32xf32>
    %105 = math.exp %104 : vector<8x32xf32>
    %cst_52 = arith.constant 1.000000e+00 : f32
    %106 = vector.broadcast %cst_52 : f32 to vector<8x32xf32>
    %107 = arith.addf %106, %105 : vector<8x32xf32>
    %108 = arith.divf %106, %107 : vector<8x32xf32>
    %109 = vector.extract_strided_slice %34 {offsets = [16, 0], sizes = [8, 32], strides = [1, 1]} : vector<64x32xf32> to vector<8x32xf32>
    %110 = arith.addf %109, %99 : vector<8x32xf32>
    %111 = arith.negf %110 : vector<8x32xf32>
    %112 = math.exp %111 : vector<8x32xf32>
    %cst_53 = arith.constant 1.000000e+00 : f32
    %113 = vector.broadcast %cst_53 : f32 to vector<8x32xf32>
    %114 = arith.addf %113, %112 : vector<8x32xf32>
    %115 = arith.divf %113, %114 : vector<8x32xf32>
    %116 = vector.extract_strided_slice %37 {offsets = [16, 0], sizes = [8, 32], strides = [1, 1]} : vector<64x32xf32> to vector<8x32xf32>
    %117 = arith.mulf %108, %101 : vector<8x32xf32>
    %118 = arith.addf %116, %117 : vector<8x32xf32>
    %119 = math.tanh %118 : vector<8x32xf32>
    %cst_54 = arith.constant 1.000000e+00 : f32
    %120 = vector.broadcast %cst_54 : f32 to vector<8x32xf32>
    %121 = arith.subf %120, %115 : vector<8x32xf32>
    %122 = arith.mulf %121, %119 : vector<8x32xf32>
    %123 = arith.mulf %115, %96 : vector<8x32xf32>
    %124 = arith.addf %122, %123 : vector<8x32xf32>
    %125 = arith.truncf %124 : vector<8x32xf32> to vector<8x32xbf16>
    %cst_55 = arith.constant dense<0.000000e+00> : vector<8x32xf32>
    %126 = tpu.matmul %125, %10, %cst_55 {dimension_numbers = #tpu.dot_dimension_numbers<[1], [0], [0], [1], [0, 0, 1, 1], [], []>} : vector<8x32xbf16>, vector<32x32xbf16>, vector<8x32xf32> -> vector<8x32xf32>
    %cst_56 = arith.constant dense<0.000000e+00> : vector<8x32xf32>
    %127 = tpu.matmul %125, %11, %cst_56 {dimension_numbers = #tpu.dot_dimension_numbers<[1], [0], [0], [1], [0, 0, 1, 1], [], []>} : vector<8x32xbf16>, vector<32x32xbf16>, vector<8x32xf32> -> vector<8x32xf32>
    %cst_57 = arith.constant dense<0.000000e+00> : vector<8x32xf32>
    %128 = tpu.matmul %125, %12, %cst_57 {dimension_numbers = #tpu.dot_dimension_numbers<[1], [0], [0], [1], [0, 0, 1, 1], [], []>} : vector<8x32xbf16>, vector<32x32xbf16>, vector<8x32xf32> -> vector<8x32xf32>
    %129 = arith.addf %128, %15 : vector<8x32xf32>
    %130 = vector.extract_strided_slice %31 {offsets = [24, 0], sizes = [8, 32], strides = [1, 1]} : vector<64x32xf32> to vector<8x32xf32>
    %131 = arith.addf %130, %126 : vector<8x32xf32>
    %132 = arith.negf %131 : vector<8x32xf32>
    %133 = math.exp %132 : vector<8x32xf32>
    %cst_58 = arith.constant 1.000000e+00 : f32
    %134 = vector.broadcast %cst_58 : f32 to vector<8x32xf32>
    %135 = arith.addf %134, %133 : vector<8x32xf32>
    %136 = arith.divf %134, %135 : vector<8x32xf32>
    %137 = vector.extract_strided_slice %34 {offsets = [24, 0], sizes = [8, 32], strides = [1, 1]} : vector<64x32xf32> to vector<8x32xf32>
    %138 = arith.addf %137, %127 : vector<8x32xf32>
    %139 = arith.negf %138 : vector<8x32xf32>
    %140 = math.exp %139 : vector<8x32xf32>
    %cst_59 = arith.constant 1.000000e+00 : f32
    %141 = vector.broadcast %cst_59 : f32 to vector<8x32xf32>
    %142 = arith.addf %141, %140 : vector<8x32xf32>
    %143 = arith.divf %141, %142 : vector<8x32xf32>
    %144 = vector.extract_strided_slice %37 {offsets = [24, 0], sizes = [8, 32], strides = [1, 1]} : vector<64x32xf32> to vector<8x32xf32>
    %145 = arith.mulf %136, %129 : vector<8x32xf32>
    %146 = arith.addf %144, %145 : vector<8x32xf32>
    %147 = math.tanh %146 : vector<8x32xf32>
    %cst_60 = arith.constant 1.000000e+00 : f32
    %148 = vector.broadcast %cst_60 : f32 to vector<8x32xf32>
    %149 = arith.subf %148, %143 : vector<8x32xf32>
    %150 = arith.mulf %149, %147 : vector<8x32xf32>
    %151 = arith.mulf %143, %124 : vector<8x32xf32>
    %152 = arith.addf %150, %151 : vector<8x32xf32>
    %153 = arith.truncf %152 : vector<8x32xf32> to vector<8x32xbf16>
    %cst_61 = arith.constant dense<0.000000e+00> : vector<8x32xf32>
    %154 = tpu.matmul %153, %10, %cst_61 {dimension_numbers = #tpu.dot_dimension_numbers<[1], [0], [0], [1], [0, 0, 1, 1], [], []>} : vector<8x32xbf16>, vector<32x32xbf16>, vector<8x32xf32> -> vector<8x32xf32>
    %cst_62 = arith.constant dense<0.000000e+00> : vector<8x32xf32>
    %155 = tpu.matmul %153, %11, %cst_62 {dimension_numbers = #tpu.dot_dimension_numbers<[1], [0], [0], [1], [0, 0, 1, 1], [], []>} : vector<8x32xbf16>, vector<32x32xbf16>, vector<8x32xf32> -> vector<8x32xf32>
    %cst_63 = arith.constant dense<0.000000e+00> : vector<8x32xf32>
    %156 = tpu.matmul %153, %12, %cst_63 {dimension_numbers = #tpu.dot_dimension_numbers<[1], [0], [0], [1], [0, 0, 1, 1], [], []>} : vector<8x32xbf16>, vector<32x32xbf16>, vector<8x32xf32> -> vector<8x32xf32>
    %157 = arith.addf %156, %15 : vector<8x32xf32>
    %158 = vector.extract_strided_slice %31 {offsets = [32, 0], sizes = [8, 32], strides = [1, 1]} : vector<64x32xf32> to vector<8x32xf32>
    %159 = arith.addf %158, %154 : vector<8x32xf32>
    %160 = arith.negf %159 : vector<8x32xf32>
    %161 = math.exp %160 : vector<8x32xf32>
    %cst_64 = arith.constant 1.000000e+00 : f32
    %162 = vector.broadcast %cst_64 : f32 to vector<8x32xf32>
    %163 = arith.addf %162, %161 : vector<8x32xf32>
    %164 = arith.divf %162, %163 : vector<8x32xf32>
    %165 = vector.extract_strided_slice %34 {offsets = [32, 0], sizes = [8, 32], strides = [1, 1]} : vector<64x32xf32> to vector<8x32xf32>
    %166 = arith.addf %165, %155 : vector<8x32xf32>
    %167 = arith.negf %166 : vector<8x32xf32>
    %168 = math.exp %167 : vector<8x32xf32>
    %cst_65 = arith.constant 1.000000e+00 : f32
    %169 = vector.broadcast %cst_65 : f32 to vector<8x32xf32>
    %170 = arith.addf %169, %168 : vector<8x32xf32>
    %171 = arith.divf %169, %170 : vector<8x32xf32>
    %172 = vector.extract_strided_slice %37 {offsets = [32, 0], sizes = [8, 32], strides = [1, 1]} : vector<64x32xf32> to vector<8x32xf32>
    %173 = arith.mulf %164, %157 : vector<8x32xf32>
    %174 = arith.addf %172, %173 : vector<8x32xf32>
    %175 = math.tanh %174 : vector<8x32xf32>
    %cst_66 = arith.constant 1.000000e+00 : f32
    %176 = vector.broadcast %cst_66 : f32 to vector<8x32xf32>
    %177 = arith.subf %176, %171 : vector<8x32xf32>
    %178 = arith.mulf %177, %175 : vector<8x32xf32>
    %179 = arith.mulf %171, %152 : vector<8x32xf32>
    %180 = arith.addf %178, %179 : vector<8x32xf32>
    %181 = arith.truncf %180 : vector<8x32xf32> to vector<8x32xbf16>
    %cst_67 = arith.constant dense<0.000000e+00> : vector<8x32xf32>
    %182 = tpu.matmul %181, %10, %cst_67 {dimension_numbers = #tpu.dot_dimension_numbers<[1], [0], [0], [1], [0, 0, 1, 1], [], []>} : vector<8x32xbf16>, vector<32x32xbf16>, vector<8x32xf32> -> vector<8x32xf32>
    %cst_68 = arith.constant dense<0.000000e+00> : vector<8x32xf32>
    %183 = tpu.matmul %181, %11, %cst_68 {dimension_numbers = #tpu.dot_dimension_numbers<[1], [0], [0], [1], [0, 0, 1, 1], [], []>} : vector<8x32xbf16>, vector<32x32xbf16>, vector<8x32xf32> -> vector<8x32xf32>
    %cst_69 = arith.constant dense<0.000000e+00> : vector<8x32xf32>
    %184 = tpu.matmul %181, %12, %cst_69 {dimension_numbers = #tpu.dot_dimension_numbers<[1], [0], [0], [1], [0, 0, 1, 1], [], []>} : vector<8x32xbf16>, vector<32x32xbf16>, vector<8x32xf32> -> vector<8x32xf32>
    %185 = arith.addf %184, %15 : vector<8x32xf32>
    %186 = vector.extract_strided_slice %31 {offsets = [40, 0], sizes = [8, 32], strides = [1, 1]} : vector<64x32xf32> to vector<8x32xf32>
    %187 = arith.addf %186, %182 : vector<8x32xf32>
    %188 = arith.negf %187 : vector<8x32xf32>
    %189 = math.exp %188 : vector<8x32xf32>
    %cst_70 = arith.constant 1.000000e+00 : f32
    %190 = vector.broadcast %cst_70 : f32 to vector<8x32xf32>
    %191 = arith.addf %190, %189 : vector<8x32xf32>
    %192 = arith.divf %190, %191 : vector<8x32xf32>
    %193 = vector.extract_strided_slice %34 {offsets = [40, 0], sizes = [8, 32], strides = [1, 1]} : vector<64x32xf32> to vector<8x32xf32>
    %194 = arith.addf %193, %183 : vector<8x32xf32>
    %195 = arith.negf %194 : vector<8x32xf32>
    %196 = math.exp %195 : vector<8x32xf32>
    %cst_71 = arith.constant 1.000000e+00 : f32
    %197 = vector.broadcast %cst_71 : f32 to vector<8x32xf32>
    %198 = arith.addf %197, %196 : vector<8x32xf32>
    %199 = arith.divf %197, %198 : vector<8x32xf32>
    %200 = vector.extract_strided_slice %37 {offsets = [40, 0], sizes = [8, 32], strides = [1, 1]} : vector<64x32xf32> to vector<8x32xf32>
    %201 = arith.mulf %192, %185 : vector<8x32xf32>
    %202 = arith.addf %200, %201 : vector<8x32xf32>
    %203 = math.tanh %202 : vector<8x32xf32>
    %cst_72 = arith.constant 1.000000e+00 : f32
    %204 = vector.broadcast %cst_72 : f32 to vector<8x32xf32>
    %205 = arith.subf %204, %199 : vector<8x32xf32>
    %206 = arith.mulf %205, %203 : vector<8x32xf32>
    %207 = arith.mulf %199, %180 : vector<8x32xf32>
    %208 = arith.addf %206, %207 : vector<8x32xf32>
    %209 = arith.truncf %208 : vector<8x32xf32> to vector<8x32xbf16>
    %cst_73 = arith.constant dense<0.000000e+00> : vector<8x32xf32>
    %210 = tpu.matmul %209, %10, %cst_73 {dimension_numbers = #tpu.dot_dimension_numbers<[1], [0], [0], [1], [0, 0, 1, 1], [], []>} : vector<8x32xbf16>, vector<32x32xbf16>, vector<8x32xf32> -> vector<8x32xf32>
    %cst_74 = arith.constant dense<0.000000e+00> : vector<8x32xf32>
    %211 = tpu.matmul %209, %11, %cst_74 {dimension_numbers = #tpu.dot_dimension_numbers<[1], [0], [0], [1], [0, 0, 1, 1], [], []>} : vector<8x32xbf16>, vector<32x32xbf16>, vector<8x32xf32> -> vector<8x32xf32>
    %cst_75 = arith.constant dense<0.000000e+00> : vector<8x32xf32>
    %212 = tpu.matmul %209, %12, %cst_75 {dimension_numbers = #tpu.dot_dimension_numbers<[1], [0], [0], [1], [0, 0, 1, 1], [], []>} : vector<8x32xbf16>, vector<32x32xbf16>, vector<8x32xf32> -> vector<8x32xf32>
    %213 = arith.addf %212, %15 : vector<8x32xf32>
    %214 = vector.extract_strided_slice %31 {offsets = [48, 0], sizes = [8, 32], strides = [1, 1]} : vector<64x32xf32> to vector<8x32xf32>
    %215 = arith.addf %214, %210 : vector<8x32xf32>
    %216 = arith.negf %215 : vector<8x32xf32>
    %217 = math.exp %216 : vector<8x32xf32>
    %cst_76 = arith.constant 1.000000e+00 : f32
    %218 = vector.broadcast %cst_76 : f32 to vector<8x32xf32>
    %219 = arith.addf %218, %217 : vector<8x32xf32>
    %220 = arith.divf %218, %219 : vector<8x32xf32>
    %221 = vector.extract_strided_slice %34 {offsets = [48, 0], sizes = [8, 32], strides = [1, 1]} : vector<64x32xf32> to vector<8x32xf32>
    %222 = arith.addf %221, %211 : vector<8x32xf32>
    %223 = arith.negf %222 : vector<8x32xf32>
    %224 = math.exp %223 : vector<8x32xf32>
    %cst_77 = arith.constant 1.000000e+00 : f32
    %225 = vector.broadcast %cst_77 : f32 to vector<8x32xf32>
    %226 = arith.addf %225, %224 : vector<8x32xf32>
    %227 = arith.divf %225, %226 : vector<8x32xf32>
    %228 = vector.extract_strided_slice %37 {offsets = [48, 0], sizes = [8, 32], strides = [1, 1]} : vector<64x32xf32> to vector<8x32xf32>
    %229 = arith.mulf %220, %213 : vector<8x32xf32>
    %230 = arith.addf %228, %229 : vector<8x32xf32>
    %231 = math.tanh %230 : vector<8x32xf32>
    %cst_78 = arith.constant 1.000000e+00 : f32
    %232 = vector.broadcast %cst_78 : f32 to vector<8x32xf32>
    %233 = arith.subf %232, %227 : vector<8x32xf32>
    %234 = arith.mulf %233, %231 : vector<8x32xf32>
    %235 = arith.mulf %227, %208 : vector<8x32xf32>
    %236 = arith.addf %234, %235 : vector<8x32xf32>
    %237 = arith.truncf %236 : vector<8x32xf32> to vector<8x32xbf16>
    %cst_79 = arith.constant dense<0.000000e+00> : vector<8x32xf32>
    %238 = tpu.matmul %237, %10, %cst_79 {dimension_numbers = #tpu.dot_dimension_numbers<[1], [0], [0], [1], [0, 0, 1, 1], [], []>} : vector<8x32xbf16>, vector<32x32xbf16>, vector<8x32xf32> -> vector<8x32xf32>
    %cst_80 = arith.constant dense<0.000000e+00> : vector<8x32xf32>
    %239 = tpu.matmul %237, %11, %cst_80 {dimension_numbers = #tpu.dot_dimension_numbers<[1], [0], [0], [1], [0, 0, 1, 1], [], []>} : vector<8x32xbf16>, vector<32x32xbf16>, vector<8x32xf32> -> vector<8x32xf32>
    %cst_81 = arith.constant dense<0.000000e+00> : vector<8x32xf32>
    %240 = tpu.matmul %237, %12, %cst_81 {dimension_numbers = #tpu.dot_dimension_numbers<[1], [0], [0], [1], [0, 0, 1, 1], [], []>} : vector<8x32xbf16>, vector<32x32xbf16>, vector<8x32xf32> -> vector<8x32xf32>
    %241 = arith.addf %240, %15 : vector<8x32xf32>
    %242 = vector.extract_strided_slice %31 {offsets = [56, 0], sizes = [8, 32], strides = [1, 1]} : vector<64x32xf32> to vector<8x32xf32>
    %243 = arith.addf %242, %238 : vector<8x32xf32>
    %244 = arith.negf %243 : vector<8x32xf32>
    %245 = math.exp %244 : vector<8x32xf32>
    %cst_82 = arith.constant 1.000000e+00 : f32
    %246 = vector.broadcast %cst_82 : f32 to vector<8x32xf32>
    %247 = arith.addf %246, %245 : vector<8x32xf32>
    %248 = arith.divf %246, %247 : vector<8x32xf32>
    %249 = vector.extract_strided_slice %34 {offsets = [56, 0], sizes = [8, 32], strides = [1, 1]} : vector<64x32xf32> to vector<8x32xf32>
    %250 = arith.addf %249, %239 : vector<8x32xf32>
    %251 = arith.negf %250 : vector<8x32xf32>
    %252 = math.exp %251 : vector<8x32xf32>
    %cst_83 = arith.constant 1.000000e+00 : f32
    %253 = vector.broadcast %cst_83 : f32 to vector<8x32xf32>
    %254 = arith.addf %253, %252 : vector<8x32xf32>
    %255 = arith.divf %253, %254 : vector<8x32xf32>
    %256 = vector.extract_strided_slice %37 {offsets = [56, 0], sizes = [8, 32], strides = [1, 1]} : vector<64x32xf32> to vector<8x32xf32>
    %257 = arith.mulf %248, %241 : vector<8x32xf32>
    %258 = arith.addf %256, %257 : vector<8x32xf32>
    %259 = math.tanh %258 : vector<8x32xf32>
    %cst_84 = arith.constant 1.000000e+00 : f32
    %260 = vector.broadcast %cst_84 : f32 to vector<8x32xf32>
    %261 = arith.subf %260, %255 : vector<8x32xf32>
    %262 = arith.mulf %261, %259 : vector<8x32xf32>
    %263 = arith.mulf %255, %236 : vector<8x32xf32>
    %264 = arith.addf %262, %263 : vector<8x32xf32>
    %265 = arith.truncf %264 : vector<8x32xf32> to vector<8x32xbf16>
    %c0_85 = arith.constant 0 : index
    %c0_86 = arith.constant 0 : index
    %266 = vector.load %arg16[%c0_85, %c0_86] : memref<32x128xbf16, #tpu.memory_space<vmem>>, vector<32x128xbf16>
    %cst_87 = arith.constant dense<0.000000e+00> : vector<8x128xf32>
    %267 = tpu.matmul %265, %266, %cst_87 {dimension_numbers = #tpu.dot_dimension_numbers<[1], [0], [0], [1], [0, 0, 1, 1], [], []>} : vector<8x32xbf16>, vector<32x128xbf16>, vector<8x128xf32> -> vector<8x128xf32>
    %c0_88 = arith.constant 0 : index
    %c0_89 = arith.constant 0 : index
    %268 = vector.load %arg17[%c0_88, %c0_89] : memref<1x128xf32, #tpu.memory_space<vmem>>, vector<1x128xf32>
    %269 = vector.broadcast %268 : vector<1x128xf32> to vector<8x128xf32>
    %270 = arith.addf %267, %269 : vector<8x128xf32>
    %cst_90 = arith.constant 0.000000e+00 : f32
    %271 = vector.broadcast %cst_90 : f32 to vector<8x128xf32>
    %272 = arith.maximumf %270, %271 : vector<8x128xf32>
    %273 = arith.truncf %272 : vector<8x128xf32> to vector<8x128xbf16>
    %c0_91 = arith.constant 0 : index
    %c0_92 = arith.constant 0 : index
    %274 = vector.load %arg18[%c0_91, %c0_92] : memref<128x64xbf16, #tpu.memory_space<vmem>>, vector<128x64xbf16>
    %cst_93 = arith.constant dense<0.000000e+00> : vector<8x64xf32>
    %275 = tpu.matmul %273, %274, %cst_93 {dimension_numbers = #tpu.dot_dimension_numbers<[1], [0], [0], [1], [0, 0, 1, 1], [], []>} : vector<8x128xbf16>, vector<128x64xbf16>, vector<8x64xf32> -> vector<8x64xf32>
    %c0_94 = arith.constant 0 : index
    %c0_95 = arith.constant 0 : index
    %276 = vector.load %arg19[%c0_94, %c0_95] : memref<1x64xf32, #tpu.memory_space<vmem>>, vector<1x64xf32>
    %277 = vector.broadcast %276 : vector<1x64xf32> to vector<8x64xf32>
    %278 = arith.addf %275, %277 : vector<8x64xf32>
    %cst_96 = arith.constant 0.000000e+00 : f32
    %279 = vector.broadcast %cst_96 : f32 to vector<8x64xf32>
    %280 = arith.maximumf %278, %279 : vector<8x64xf32>
    %281 = arith.truncf %280 : vector<8x64xf32> to vector<8x64xbf16>
    %c0_97 = arith.constant 0 : index
    %c0_98 = arith.constant 0 : index
    %282 = vector.load %arg20[%c0_97, %c0_98] : memref<64x32xbf16, #tpu.memory_space<vmem>>, vector<64x32xbf16>
    %cst_99 = arith.constant dense<0.000000e+00> : vector<8x32xf32>
    %283 = tpu.matmul %281, %282, %cst_99 {dimension_numbers = #tpu.dot_dimension_numbers<[1], [0], [0], [1], [0, 0, 1, 1], [], []>} : vector<8x64xbf16>, vector<64x32xbf16>, vector<8x32xf32> -> vector<8x32xf32>
    %c0_100 = arith.constant 0 : index
    %c0_101 = arith.constant 0 : index
    %284 = vector.load %arg21[%c0_100, %c0_101] : memref<1x32xf32, #tpu.memory_space<vmem>>, vector<1x32xf32>
    %285 = vector.broadcast %284 : vector<1x32xf32> to vector<8x32xf32>
    %286 = arith.addf %283, %285 : vector<8x32xf32>
    %cst_102 = arith.constant 0.000000e+00 : f32
    %287 = vector.broadcast %cst_102 : f32 to vector<8x32xf32>
    %288 = arith.maximumf %286, %287 : vector<8x32xf32>
    %289 = arith.truncf %288 : vector<8x32xf32> to vector<8x32xbf16>
    %c0_103 = arith.constant 0 : index
    %c0_104 = arith.constant 0 : index
    %290 = vector.load %arg22[%c0_103, %c0_104] : memref<32x128xbf16, #tpu.memory_space<vmem>>, vector<32x128xbf16>
    %cst_105 = arith.constant dense<0.000000e+00> : vector<8x128xf32>
    %291 = tpu.matmul %289, %290, %cst_105 {dimension_numbers = #tpu.dot_dimension_numbers<[1], [0], [0], [1], [0, 0, 1, 1], [], []>} : vector<8x32xbf16>, vector<32x128xbf16>, vector<8x128xf32> -> vector<8x128xf32>
    %c0_106 = arith.constant 0 : index
    %c0_107 = arith.constant 0 : index
    %292 = vector.load %arg23[%c0_106, %c0_107] : memref<1x128xf32, #tpu.memory_space<vmem>>, vector<1x128xf32>
    %293 = vector.broadcast %292 : vector<1x128xf32> to vector<8x128xf32>
    %294 = arith.addf %291, %293 : vector<8x128xf32>
    %295 = arith.negf %294 : vector<8x128xf32>
    %296 = math.exp %295 : vector<8x128xf32>
    %cst_108 = arith.constant 1.000000e+00 : f32
    %297 = vector.broadcast %cst_108 : f32 to vector<8x128xf32>
    %298 = arith.addf %297, %296 : vector<8x128xf32>
    %299 = arith.divf %297, %298 : vector<8x128xf32>
    %c0_109 = arith.constant 0 : index
    %c0_110 = arith.constant 0 : index
    %300 = vector.load %arg24[%c0_109, %c0_110] : memref<8x128xf32, #tpu.memory_space<vmem>>, vector<8x128xf32>
    tpu.vector_store %arg24[%c0_109, %c0_110], %299 {strides = array<i32>} : memref<8x128xf32, #tpu.memory_space<vmem>>, vector<8x128xf32>,
    return
  }
}

</mosaic_0001>

<bundles_post_ra>
// kernel: tpu_custom_call.1
= control target key start
LH: loop header
LB: loop body
LE: loop exit
PB: predicated region body
PF: predicated region fallthrough
CT: control target
= control target key end

     0   :  { %s2572_s0 = inlined_call_operand.vmem [shape: bf16[64,16], index: 0, kind: input, shape index: {}]   ;;  %s2573_s1 = inlined_call_operand.hbm [shape: bf16[16,32], index: 1, kind: input, shape index: {}]   ;;  %s2574_s2 = inlined_call_operand.hbm [shape: f32[1,32], index: 2, kind: input, shape index: {}]   ;;  %s2575_s3 = inlined_call_operand.vmem [shape: bf16[32,32], index: 3, kind: input, shape index: {}]   ;;  %s2576_s4 = inlined_call_operand.hbm [shape: f32[1,32], index: 4, kind: input, shape index: {}]   ;;  %s2577_s5 = inlined_call_operand.vmem [shape: bf16[32,32], index: 5, kind: input, shape index: {}]   ;;  %s2578_s6 = inlined_call_operand.vmem [shape: bf16[32,32], index: 6, kind: input, shape index: {}]   ;;  %s2579_s7 = inlined_call_operand.vmem [shape: bf16[32,32], index: 7, kind: input, shape index: {}]   ;;  %s2580_s8 = inlined_call_operand.hbm [shape: f32[1,32], index: 8, kind: input, shape index: {}]   ;;  %s2581_s9 = inlined_call_operand.hbm [shape: f32[1,32], index: 9, kind: input, shape index: {}]   ;;  %s2582_s10 = inlined_call_operand.hbm [shape: f32[1,32], index: 10, kind: input, shape index: {}]   ;;  %s2583_s11 = inlined_call_operand.hbm [shape: f32[1,32], index: 11, kind: input, shape index: {}]   ;;  %s2584_s12 = inlined_call_operand.vmem [shape: bf16[32,32], index: 12, kind: input, shape index: {}]   ;;  %s2585_s13 = inlined_call_operand.vmem [shape: bf16[32,32], index: 13, kind: input, shape index: {}]   ;;  %s2586_s14 = inlined_call_operand.vmem [shape: bf16[32,32], index: 14, kind: input, shape index: {}]   ;;  %s2587_s15 = inlined_call_operand.vmem [shape: f32[1,32], index: 15, kind: input, shape index: {}]   ;;  %s2588_s16 = inlined_call_operand.vmem [shape: bf16[32,128], index: 16, kind: input, shape index: {}]   ;;  %s2589_s17 = inlined_call_operand.vmem [shape: f32[1,128], index: 17, kind: input, shape index: {}]   ;;  %s2590_s18 = inlined_call_operand.vmem [shape: bf16[128,64], index: 18, kind: input, shape index: {}]   ;;  %s2591_s19 = inlined_call_operand.vmem [shape: f32[1,64], index: 19, kind: input, shape index: {}]   ;;  %s2592_s20 = inlined_call_operand.vmem [shape: bf16[64,32], index: 20, kind: input, shape index: {}]   ;;  %s2593_s21 = inlined_call_operand.vmem [shape: f32[1,32], index: 21, kind: input, shape index: {}]   ;;  %s2594_s22 = inlined_call_operand.vmem [shape: bf16[32,128], index: 22, kind: input, shape index: {}]   ;;  %s2595_s23 = inlined_call_operand.vmem [shape: f32[1,128], index: 23, kind: input, shape index: {}]   ;;  %s2596_s24 = inlined_call_operand.hbm [shape: f32[8,128], index: 24, kind: output, shape index: {}]  }
   0x1   :  { %2602 = sst [smem:[#allocation20_spill]] %s2572_s0 }
   0x2   :  { %2603 = sst [smem:[#allocation21_spill]] %s2573_s1 }
   0x3   :  { %2604 = sst [smem:[#allocation22_spill]] %s2574_s2 }
   0x4   :  { %2605 = sst [smem:[#allocation23_spill]] %s2575_s3 }
   0x5   :  { %2606 = sst [smem:[#allocation24_spill]] %s2576_s4 }
   0x6   :  { %2607 = sst [smem:[#allocation25_spill]] %s2577_s5 }
   0x7   :  { %2608 = sst [smem:[#allocation26_spill]] %s2578_s6 }
   0x8   :  { %2609 = sst [smem:[#allocation27_spill]] %s2579_s7 }
   0x9   :  { %2610 = sst [smem:[#allocation28_spill]] %s2580_s8 }
   0xa   :  { %2611 = sst [smem:[#allocation29_spill]] %s2595_s23 }
   0xb   :  { %2612 = sst [smem:[#allocation30_spill]] %s2596_s24 }
   0xc   :  { %29 = vsyncpa [#allocation3], 0 }
   0xd   :  { %30 = vsyncpa [#allocation6], 0 }
   0xe   :  { %31 = vsyncpa [#allocation9], 0 }
   0xf   :  { %32 = vsyncpa [#allocation12], 0  ;;  %s2613_s27 = sld [smem:[#allocation22_spill]] }
  0x15   :  { %s54_s28 = sshll.u32 %s2613_s27, 4  ;;  %s55_s28 = int_to_ptr.hbm [resolvable:$true] %s54_s28 }
  0x16   :  { %33 = vsyncpa [#allocation4], 0  ;;  %s2078_s6 = smov [#allocation5]   ;;  %s2614_s7 = sld [smem:[#allocation28_spill]] }
  0x17   :  { %s56_s2 = sshll.u32 %s2078_s6, 4  ;;  %s2079_s3 = smov [#allocation8]   ;;  %s57_s2 = int_to_ptr.vmem [resolvable:$true] %s56_s2 }
  0x18   :  { %59 = dma.hbm_to_vmem [thread:$0]  %s55_s28, 16, %s57_s2, [#allocation6]  }
  0x19   :  { %s86_s25 = sshll.u32 %s2079_s3, 4  ;;  %s106_s1 = sshll.u32 %s2582_s10, 4  ;;  %s87_s25 = int_to_ptr.vmem [resolvable:$true] %s86_s25  ;;  %s107_s1 = int_to_ptr.hbm [resolvable:$true] %s106_s1 }
  0x1a   :  { %s2615_s27 = sld [smem:[#allocation21_spill]]  ;;  %s2080_s24 = smov [#allocation11]  }
  0x1b   :  { %s108_s23 = sshll.u32 %s2080_s24, 4  ;;  %s2081_s28 = smov [#allocation2]   ;;  %s109_s23 = int_to_ptr.vmem [resolvable:$true] %s108_s23 }
  0x1c   :  { %s84_s30 = sshll.u32 %s2614_s7, 4  ;;  %s42_s2 = sshll.u32 %s2081_s28, 4  ;;  %s85_s30 = int_to_ptr.hbm [resolvable:$true] %s84_s30  ;;  %s43_s2 = int_to_ptr.vmem [resolvable:$true] %s42_s2 }
  0x1d   :  { %89 = dma.hbm_to_vmem [thread:$0]  %s85_s30, 16, %s87_s25, [#allocation9]  }
  0x1e   :  { %111 = dma.hbm_to_vmem [thread:$0]  %s107_s1, 16, %s109_s23, [#allocation12]  }
  0x1f   :  { %s2082_s29 = smov 64   ;;  %s2083_s0 = smov 4  }
  0x20   :  { %s40_s6 = sshll.u32 %s2615_s27, 4  ;;  %s2616_s3 = sld [smem:[#allocation24_spill]]  ;;  %s41_s6 = int_to_ptr.hbm [resolvable:$true] %s40_s6 }
  0x21   :  { %48 = dma.hbm_to_vmem [thread:$0]  %s41_s6, 128, %s43_s2, [#allocation3], %s2082_s29, %s2082_s29, %s2083_s0  }
  0x22   :  { %s2084_s30 = smov [#allocation7]   ;;  %s95_s24 = sshll.u32 %s2581_s9, 4  ;;  %s96_s24 = int_to_ptr.hbm [resolvable:$true] %s95_s24 }
  0x23   :  { %s69_s25 = sshll.u32 %s2084_s30, 4  ;;  %s2085_s23 = smov [#allocation10]   ;;  %s70_s25 = int_to_ptr.vmem [resolvable:$true] %s69_s25 }
  0x24   :  { %s97_s1 = sshll.u32 %s2085_s23, 4  ;;  %s117_s6 = sshll.u32 %s2583_s11, 4  ;;  %s98_s1 = int_to_ptr.vmem [resolvable:$true] %s97_s1  ;;  %s118_s6 = int_to_ptr.hbm [resolvable:$true] %s117_s6 }
  0x25   :  { %100 = dma.hbm_to_vmem [thread:$0]  %s96_s24, 16, %s98_s1, [#allocation9]  }
  0x26   :  { %s67_s8 = sshll.u32 %s2616_s3, 4  ;;  %s2086_s28 = smov [#allocation13]   ;;  %s68_s8 = int_to_ptr.hbm [resolvable:$true] %s67_s8 }
  0x27   :  { %72 = dma.hbm_to_vmem [thread:$0]  %s68_s8, 16, %s70_s25, [#allocation6]  }
  0x28   :  { %s119_s2 = sshll.u32 %s2086_s28, 4  ;;  %s120_s2 = int_to_ptr.vmem [resolvable:$true] %s119_s2 }
  0x29   :  { %122 = dma.hbm_to_vmem [thread:$0]  %s118_s6, 16, %s120_s2, [#allocation12]  }
  0x2a   :  { %2068 = dma.done.wait [#allocation3], 128  }
  0x2b   :  { %2069 = vsyncadd [#allocation3], 4294967168 }
  0x2c   :  { %2070 = dma.done.wait [#allocation6], 32  }
  0x2d   :  { %2071 = vsyncadd [#allocation6], 4294967264 }
  0x2e   :  { %2072 = dma.done.wait [#allocation9], 32  }
  0x2f   :  { %2073 = vsyncadd [#allocation9], 4294967264 }
  0x30   :  { %2074 = dma.done.wait [#allocation12], 32  }
  0x31   :  { %2075 = vsyncadd [#allocation12], 4294967264  ;;  %v1736_v0 = vld [vmem:[#allocation2] sm:$0xff]  ;;  %s2617_s0 = sld [smem:[#allocation20_spill]]  ;;  %vm252_vm0 = vcmask 130048   ;;  %vm321_vm1 = vcmask 261120  }
  0x32   :  { %272 = vmatpush.bf16.msra.mxu0 %v1736_v0  ;;  %s2618_s5 = sld [smem:[#allocation23_spill]]  ;;  %v1781_v8 = vld [vmem:[#allocation5] ss:$0 sm:$0xff]  ;;  %v1782_v45 = vld [vmem:[#allocation7] ss:$0 sm:$0xff]  ;;  %v2299_v54 = vld [vmem:[%s2584_s12] sm:$0xff] }
  0x33   :  { %s2619_s27 = sld [smem:[#allocation27_spill]]  ;;  %v2277_v42 = vld [vmem:[%s2584_s12 + $0x8] sm:$0xff]  ;;  %v2306_v55 = vld [vmem:[%s2585_s13] sm:$0xff] }
  0x34   :  { %s2620_s29 = sld [smem:[#allocation25_spill]]  ;;  %v2284_v43 = vld [vmem:[%s2585_s13 + $0x8] sm:$0xff]  ;;  %v2321_v63 = vld [vmem:[%s2586_s14] sm:$0xff] }
  0x35   :  { %s2621_s7 = sld [smem:[#allocation26_spill]]  ;;  %v2290_v46 = vld [vmem:[%s2586_s14 + $0x8] sm:$0xff] }
  0x36   :  { %s2622_s30 = sld [smem:[#allocation29_spill]] }
  0x37   :  { %v1751_v1 = vld [vmem:[%s2617_s0] sm:$0xff]  ;;  %v1752_v2 = vld [vmem:[%s2617_s0 + $0x8] sm:$0xff]  ;;  %v1753_v3 = vld [vmem:[%s2617_s0 + $0x10] sm:$0xff]  ;;  %s2623_s24 = sld [smem:[#allocation30_spill]] }
  0x38   :  { %1552 = vmatmul.msk.bf16.vlgmr.msra.gmra.mxu0 %vm252_vm0, %v1751_v1  ;;  %v1754_v4 = vld [vmem:[%s2617_s0 + $0x18] sm:$0xff]  ;;  %v1738_v5 = vld [vmem:[%s2618_s5 + $0x8] sm:$0xff]  ;;  %v1737_v6 = vld [vmem:[%s2618_s5] sm:$0xff] }
  0x39   :  { %340 = vmatpush.bf16.msra.mxu1 %v1738_v5  ;;  %v1744_v22 = vld [vmem:[%s2619_s27 + $0x8] sm:$0xff]  ;;  %v1743_v24 = vld [vmem:[%s2619_s27] sm:$0xff] }
  0x3a   :  { %496 = vmatpush.bf16.msrb.mxu0 %v1744_v22  ;;  %v1740_v38 = vld [vmem:[%s2620_s29 + $0x8] sm:$0xff]  ;;  %v1739_v40 = vld [vmem:[%s2620_s29] sm:$0xff] }
  0x3b   :  { %v1742_v39 = vld [vmem:[%s2621_s7 + $0x8] sm:$0xff]  ;;  %408 = vmatpush.bf16.msra.mxu2 %v1740_v38  ;;  %v1741_v41 = vld [vmem:[%s2621_s7] sm:$0xff] }
  0x3c   :  { %452 = vmatpush.bf16.msra.mxu3 %v1742_v39  ;;  %v1786_v22 = vld [vmem:[#allocation10] ss:$0 sm:$0xff] }
  0x3d   :  { %341 = vmatpush.bf16.msra.mxu1 %v1737_v6  ;;  %s1519_s23 = sshll.u32 %s2623_s24, 4  ;;  %s1520_s23 = int_to_ptr.hbm [resolvable:$true] %s1519_s23 }
  0x3e   :  { %497 = vmatpush.bf16.msrb.mxu0 %v1743_v24 }
  0x3f   :  { %409 = vmatpush.bf16.msra.mxu2 %v1739_v40 }
  0x40   :  { %453 = vmatpush.bf16.msra.mxu3 %v1741_v41 }
  0x41   :  { %659 = vmatpush.bf16.msrb.mxu1 %v2277_v42 }
  0x42   :  { %545 = vmatpush.bf16.msra.mxu0 %v2277_v42 }
  0x43   :  { %570 = vmatpush.bf16.msrb.mxu2 %v2284_v43 }
  0x44   :  { %595 = vmatpush.bf16.msrb.mxu3 %v2290_v46 }
  0x45   :  { %660 = vmatpush.bf16.msrb.mxu1 %v2299_v54 }
  0x46   :  { %546 = vmatpush.bf16.msra.mxu0 %v2299_v54 }
  0x47   :  { %571 = vmatpush.bf16.msrb.mxu2 %v2306_v55 }
  0x48   :  { %1553 = vmatmul.msk.bf16.gmra.mxu0 %vm252_vm0, %v1752_v2  ;;  %596 = vmatpush.bf16.msrb.mxu3 %v2321_v63 }
  0x58   :  { %1554 = vmatmul.msk.bf16.gmra.mxu0 %vm252_vm0, %v1753_v3 }
  0x68   :  { %1555 = vmatmul.msk.bf16.gmra.mxu0 %vm252_vm0, %v1754_v4 }
  0xb5   :  { %v274_v7 = vpop.f32.mrf.mxu0 }
  0xb6   :  { %v275_v9 = vadd.f32 %v1781_v8, %v274_v7 }
  0xb8   :  { %v294_v12 = vmax.f32 %v275_v9, 0.0 }
  0xbd   :  { %v276_v10 = vpop.f32.mrf.mxu0 }
  0xbe   :  { %v277_v11 = vadd.f32 %v1781_v8, %v276_v10 }
  0xc0   :  { %v295_v13 = vmax.f32 %v277_v11, 0.0 }
  0xc2   :  { %v302_v14 = vpack.c.bf16 %v295_v13, %v294_v12  ;;  %v2335_v13 = vld [vmem:[%s2587_s15] ss:$0 sm:$0xff] }
  0xc4   :  { %1564 = vmatmul.msk.bf16.vlgmr.msra.gmra.mxu1 %vm321_vm1, %v302_v14  ;;  %v523_v14 = vpack.c.bf16 %v2335_v13, %v2335_v13 }
  0xc5   :  { %v279_v15 = vpop.f32.mrf.mxu0  ;;  %749 = vmatpush.bf16.msra.mxu1 %v2277_v42 }
  0xc6   :  { %v280_v16 = vadd.f32 %v1781_v8, %v279_v15 }
  0xc8   :  { %v296_v19 = vmax.f32 %v280_v16, 0.0 }
  0xc9   :  { %750 = vmatpush.bf16.msra.mxu1 %v2299_v54 }
  0xcd   :  { %v281_v17 = vpop.f32.mrf.mxu0 }
  0xce   :  { %v282_v18 = vadd.f32 %v1781_v8, %v281_v17 }
  0xd0   :  { %v297_v20 = vmax.f32 %v282_v18, 0.0  ;;  %v2350_v18 = vld [vmem:[#allocation11] ss:$0 sm:$0xff] }
  0xd2   :  { %v303_v21 = vpack.c.bf16 %v297_v20, %v296_v19 }
  0xd4   :  { %1565 = vmatmul.msk.bf16.gmra.mxu1 %vm321_vm1, %v303_v21  ;;  %v1785_v21 = vld [vmem:[#allocation8] ss:$0 sm:$0xff] }
  0xd5   :  { %v284_v23 = vpop.f32.mrf.mxu0 }
  0xd6   :  { %v285_v25 = vadd.f32 %v1781_v8, %v284_v23 }
  0xd8   :  { %v298_v28 = vmax.f32 %v285_v25, 0.0 }
  0xdd   :  { %v286_v26 = vpop.f32.mrf.mxu0 }
  0xde   :  { %v287_v27 = vadd.f32 %v1781_v8, %v286_v26 }
  0xe0   :  { %v299_v29 = vmax.f32 %v287_v27, 0.0 }
  0xe2   :  { %v304_v30 = vpack.c.bf16 %v299_v29, %v298_v28 }
  0xe4   :  { %1566 = vmatmul.msk.bf16.gmra.mxu1 %vm321_vm1, %v304_v30 }
  0xe5   :  { %v289_v31 = vpop.f32.mrf.mxu0 }
  0xe6   :  { %v290_v32 = vadd.f32 %v1781_v8, %v289_v31 }
  0xe8   :  { %v300_v35 = vmax.f32 %v290_v32, 0.0 }
  0xed   :  { %v291_v33 = vpop.f32.mrf.mxu0 }
  0xee   :  { %v292_v34 = vadd.f32 %v1781_v8, %v291_v33 }
  0xf0   :  { %v301_v36 = vmax.f32 %v292_v34, 0.0 }
  0xf2   :  { %v305_v37 = vpack.c.bf16 %v301_v36, %v300_v35 }
  0xf4   :  { %1567 = vmatmul.msk.bf16.gmra.mxu1 %vm321_vm1, %v305_v37 }
 0x141   :  { %v343_v44 = vpop.f32.mrf.mxu1 }
 0x142   :  { %v344_v47 = vadd.f32 %v1782_v45, %v343_v44 }
 0x144   :  { %v363_v50 = vmax.f32 %v344_v47, 0.0 }
 0x149   :  { %v345_v48 = vpop.f32.mrf.mxu1 }
 0x14a   :  { %v346_v49 = vadd.f32 %v1782_v45, %v345_v48 }
 0x14c   :  { %v364_v51 = vmax.f32 %v346_v49, 0.0 }
 0x14e   :  { %v371_v52 = vpack.c.bf16 %v364_v51, %v363_v50 }
 0x150   :  { %1576 = vmatmul.msk.bf16.vlgmr.msra.gmra.mxu2 %vm321_vm1, %v371_v52  ;;  %1588 = vmatmul.msk.bf16.vlgmr.msra.gmra.mxu3 %vm321_vm1, %v371_v52 }
 0x151   :  { %1600 = vmatmul.msk.bf16.vlgmr.msrb.gmra.mxu0 %vm321_vm1, %v371_v52  ;;  %v348_v53 = vpop.f32.mrf.mxu1  ;;  %672 = vmatpush.bf16.msra.mxu2 %v2284_v43 }
 0x152   :  { %929 = vmatpush.bf16.msrb.mxu0 %v2277_v42  ;;  %v349_v56 = vadd.f32 %v1782_v45, %v348_v53  ;;  %685 = vmatpush.bf16.msra.mxu3 %v2290_v46 }
 0x154   :  { %v365_v59 = vmax.f32 %v349_v56, 0.0 }
 0x155   :  { %673 = vmatpush.bf16.msra.mxu2 %v2306_v55 }
 0x156   :  { %930 = vmatpush.bf16.msrb.mxu0 %v2299_v54  ;;  %686 = vmatpush.bf16.msra.mxu3 %v2321_v63 }
 0x159   :  { %v350_v57 = vpop.f32.mrf.mxu1 }
 0x15a   :  { %v351_v58 = vadd.f32 %v1782_v45, %v350_v57 }
 0x15c   :  { %v366_v60 = vmax.f32 %v351_v58, 0.0 }
 0x15e   :  { %v372_v61 = vpack.c.bf16 %v366_v60, %v365_v59 }
 0x160   :  { %1577 = vmatmul.msk.bf16.gmra.mxu2 %vm321_vm1, %v372_v61  ;;  %1589 = vmatmul.msk.bf16.gmra.mxu3 %vm321_vm1, %v372_v61 }
 0x161   :  { %1601 = vmatmul.msk.bf16.gmra.mxu0 %vm321_vm1, %v372_v61  ;;  %v353_v62 = vpop.f32.mrf.mxu1 }
 0x162   :  { %v354_v0 = vadd.f32 %v1782_v45, %v353_v62 }
 0x164   :  { %v367_v3 = vmax.f32 %v354_v0, 0.0 }
 0x169   :  { %v355_v1 = vpop.f32.mrf.mxu1 }
 0x16a   :  { %v356_v2 = vadd.f32 %v1782_v45, %v355_v1 }
 0x16c   :  { %v368_v4 = vmax.f32 %v356_v2, 0.0 }
 0x16e   :  { %v373_v5 = vpack.c.bf16 %v368_v4, %v367_v3 }
 0x170   :  { %1578 = vmatmul.msk.bf16.gmra.mxu2 %vm321_vm1, %v373_v5  ;;  %1590 = vmatmul.msk.bf16.gmra.mxu3 %vm321_vm1, %v373_v5 }
 0x171   :  { %1602 = vmatmul.msk.bf16.gmra.mxu0 %vm321_vm1, %v373_v5  ;;  %v358_v6 = vpop.f32.mrf.mxu1 }
 0x172   :  { %v359_v7 = vadd.f32 %v1782_v45, %v358_v6 }
 0x174   :  { %v369_v10 = vmax.f32 %v359_v7, 0.0 }
 0x179   :  { %v360_v8 = vpop.f32.mrf.mxu1 }
 0x17a   :  { %v361_v9 = vadd.f32 %v1782_v45, %v360_v8 }
 0x17c   :  { %v370_v11 = vmax.f32 %v361_v9, 0.0 }
 0x17e   :  { %v374_v12 = vpack.c.bf16 %v370_v11, %v369_v10 }
 0x180   :  { %1579 = vmatmul.msk.bf16.gmra.mxu2 %vm321_vm1, %v374_v12  ;;  %1591 = vmatmul.msk.bf16.gmra.mxu3 %vm321_vm1, %v374_v12 }
 0x181   :  { %1603 = vmatmul.msk.bf16.gmra.mxu0 %vm321_vm1, %v374_v12 }
 0x190   :  { %1621 = vmatmul.msk.bf16.vlgmr.msrb.gmra.mxu2 %vm321_vm1, %v523_v14  ;;  %1630 = vmatmul.msk.bf16.vlgmr.msrb.gmra.mxu3 %vm321_vm1, %v523_v14 }
 0x191   :  { %1612 = vmatmul.msk.bf16.vlgmr.msra.gmra.mxu0 %vm321_vm1, %v523_v14  ;;  %762 = vmatpush.bf16.msrb.mxu2 %v2284_v43 }
 0x192   :  { %775 = vmatpush.bf16.msrb.mxu3 %v2290_v46  ;;  %1032 = vmatpush.bf16.msra.mxu0 %v2284_v43 }
 0x195   :  { %763 = vmatpush.bf16.msrb.mxu2 %v2306_v55 }
 0x196   :  { %776 = vmatpush.bf16.msrb.mxu3 %v2321_v63  ;;  %1033 = vmatpush.bf16.msra.mxu0 %v2306_v55 }
 0x1ce   :  { %v2348_v15 = vpop.f32.mrf.mxu0 }
 0x1d3   :  { %v411_v16 = vpop.f32.mrf.mxu2  ;;  %v455_v17 = vpop.f32.mrf.mxu3 }
 0x1d4   :  { %v412_v5 = vadd.f32 %v1785_v21, %v411_v16  ;;  %v456_v9 = vadd.f32 %v1786_v22, %v455_v17 }
 0x1d6   :  { %v501_v19 = vpop.f32.mrf.mxu0 }
 0x1d7   :  { %v2353_v20 = vadd.f32 %v2350_v18, %v501_v19 }
 0x1db   :  { %v413_v23 = vpop.f32.mrf.mxu2  ;;  %v457_v24 = vpop.f32.mrf.mxu3 }
 0x1dc   :  { %v2355_v25 = vadd.f32 %v1785_v21, %v413_v23  ;;  %v2357_v26 = vadd.f32 %v1786_v22, %v457_v24 }
 0x1de   :  { %v504_v27 = vpop.f32.mrf.mxu0 }
 0x1df   :  { %v2360_v28 = vadd.f32 %v2350_v18, %v504_v27 }
 0x1e3   :  { %v416_v29 = vpop.f32.mrf.mxu2  ;;  %v460_v30 = vpop.f32.mrf.mxu3 }
 0x1e4   :  { %v2362_v31 = vadd.f32 %v1785_v21, %v416_v29  ;;  %v2364_v32 = vadd.f32 %v1786_v22, %v460_v30 }
 0x1e6   :  { %v506_v33 = vpop.f32.mrf.mxu0 }
 0x1e7   :  { %v2367_v34 = vadd.f32 %v2350_v18, %v506_v33 }
 0x1eb   :  { %v418_v35 = vpop.f32.mrf.mxu2  ;;  %v462_v36 = vpop.f32.mrf.mxu3 }
 0x1ec   :  { %v2369_v37 = vadd.f32 %v1785_v21, %v418_v35  ;;  %v2371_v38 = vadd.f32 %v1786_v22, %v462_v36  ;;  %v2401_v35 = vld [vmem:[#allocation13] ss:$0 sm:$0xff] }
 0x1ee   :  { %v509_v39 = vpop.f32.mrf.mxu0 }
 0x1ef   :  { %v2374_v40 = vadd.f32 %v2350_v18, %v509_v39 }
 0x1f3   :  { %v421_v41 = vpop.f32.mrf.mxu2  ;;  %v465_v44 = vpop.f32.mrf.mxu3 }
 0x1f4   :  { %v2376_v45 = vadd.f32 %v1785_v21, %v421_v41  ;;  %v2378_v47 = vadd.f32 %v1786_v22, %v465_v44 }
 0x1f6   :  { %v511_v48 = vpop.f32.mrf.mxu0 }
 0x1f7   :  { %v2381_v49 = vadd.f32 %v2350_v18, %v511_v48 }
 0x1fb   :  { %v423_v50 = vpop.f32.mrf.mxu2  ;;  %v467_v51 = vpop.f32.mrf.mxu3 }
 0x1fc   :  { %v2383_v52 = vadd.f32 %v1785_v21, %v423_v50  ;;  %v2385_v53 = vadd.f32 %v1786_v22, %v467_v51 }
 0x1fe   :  { %v514_v56 = vpop.f32.mrf.mxu0 }
 0x1ff   :  { %v2388_v57 = vadd.f32 %v2350_v18, %v514_v56 }
 0x203   :  { %v426_v58 = vpop.f32.mrf.mxu2  ;;  %v470_v59 = vpop.f32.mrf.mxu3 }
 0x204   :  { %v2390_v60 = vadd.f32 %v1785_v21, %v426_v58  ;;  %v2392_v61 = vadd.f32 %v1786_v22, %v470_v59 }
 0x206   :  { %v516_v62 = vpop.f32.mrf.mxu0 }
 0x207   :  { %v2395_v0 = vadd.f32 %v2350_v18, %v516_v62 }
 0x20b   :  { %v428_v1 = vpop.f32.mrf.mxu2  ;;  %v472_v2 = vpop.f32.mrf.mxu3 }
 0x20c   :  { %v2397_v3 = vadd.f32 %v1785_v21, %v428_v1  ;;  %v2399_v4 = vadd.f32 %v1786_v22, %v472_v2  ;;  %v500_v1 = vadd.f32 %v2350_v18, %v2348_v15 }
 0x20e   :  { %v548_v6 = vpop.f32.mrf.mxu0 }
 0x20f   :  { %v602_v7 = vadd.f32 %v548_v6, %v412_v5 }
 0x211   :  { %v1631_v8 = vmul.f32 -1.442695, %v602_v7 }
 0x213   :  { %1792 = vpow2.f32 %v1631_v8  ;;  %v573_v10 = vpop.f32.mrf.mxu2  ;;  %v598_v11 = vpop.f32.mrf.mxu3 }
 0x214   :  { %v622_v12 = vadd.f32 %v573_v10, %v456_v9  ;;  %v599_v48 = vadd.f32 %v2401_v35, %v598_v11 }
 0x216   :  { %v1632_v14 = vmul.f32 -1.442695, %v622_v12  ;;  %v550_v19 = vpop.f32.mrf.mxu0 }
 0x218   :  { %1794 = vpow2.f32 %v1632_v14 }
 0x219   :  { %v1793_v23 = vpop.eup %1792 }
 0x21a   :  { %v606_v24 = vadd.f32 1.0, %v1793_v23 }
 0x21b   :  { %v575_v27 = vpop.f32.mrf.mxu2  ;;  %v600_v29 = vpop.f32.mrf.mxu3 }
 0x21c   :  { %1796 = vrcp.f32 %v606_v24  ;;  %v618_v22 = vand.u32 2147483648, %v606_v24  ;;  %v616_v41 = vand.u32 2147483647, %v606_v24  ;;  %vm612_vm3 = vweird.f32 %v606_v24 }
 0x21e   :  { %v1795_v30 = vpop.eup %1794  ;;  %v619_v56 = vor.u32 1.1754944e-38, %v618_v22  ;;  %vm617_vm5 = vcmp.eq.f32.partialorder %v616_v41, 8.507059e+37 }
 0x21f   :  { %v626_v33 = vadd.f32 1.0, %v1795_v30 }
 0x221   :  { %1798 = vrcp.f32 %v626_v33  ;;  %v638_v2 = vand.u32 2147483648, %v626_v33  ;;  %vm632_vm7 = vweird.f32 %v626_v33  ;;  %v636_v7 = vand.u32 2147483647, %v626_v33 }
 0x222   :  { %v1797_v16 = vpop.eup %1796 }
 0x223   :  { %v608_v21 = vmul.f32 %v1797_v16, %v606_v24  ;;  %vm613_vm2 = vweird.f32 %v1797_v16  ;;  %v639_v10 = vor.u32 1.1754944e-38, %v638_v2  ;;  %vm637_vm9 = vcmp.eq.f32.partialorder %v636_v7, 8.507059e+37 }
 0x224   :  { %vm614_vm4 = vmor %vm612_vm3, %vm613_vm2 }
 0x225   :  { %v609_v17 = vsub.f32 1.0, %v608_v21 }
 0x227   :  { %v1799_v36 = vpop.eup %1798  ;;  %v610_v39 = vmul.f32 %v1797_v16, %v609_v17 }
 0x228   :  { %v628_v44 = vmul.f32 %v1799_v36, %v626_v33  ;;  %vm633_vm6 = vweird.f32 %v1799_v36 }
 0x229   :  { %v611_v50 = vadd.f32 %v1797_v16, %v610_v39  ;;  %vm634_vm8 = vmor %vm632_vm7, %vm633_vm6 }
 0x22a   :  { %v629_v51 = vsub.f32 1.0, %v628_v44 }
 0x22b   :  { %v615_v58 = vsel %vm614_vm4, %v1797_v16, %v611_v50 }
 0x22c   :  { %v630_v59 = vmul.f32 %v1799_v36, %v629_v51  ;;  %v620_v62 = vsel %vm617_vm5, %v619_v56, %v615_v58 }
 0x22d   :  { %v642_v5 = vmul.f32 %v620_v62, %v599_v48 }
 0x22e   :  { %v631_v6 = vadd.f32 %v1799_v36, %v630_v59 }
 0x22f   :  { %v643_v8 = vadd.f32 %v642_v5, %v500_v1 }
 0x230   :  { %v635_v9 = vsel %vm634_vm8, %v1799_v36, %v631_v6 }
 0x231   :  { %1800 = vtanh.f32 %v643_v8  ;;  %v640_v11 = vsel %vm637_vm9, %v639_v10, %v635_v9 }
 0x232   :  { %v645_v12 = vsub.f32 1.0, %v640_v11  ;;  %v647_v23 = vmul.f32 %v2335_v13, %v640_v11 }
 0x237   :  { %v1801_v14 = vpop.eup %1800 }
 0x238   :  { %v646_v19 = vmul.f32 %v1801_v14, %v645_v12 }
 0x23a   :  { %v2407_v24 = vadd.f32 %v647_v23, %v646_v19 }
 0x23c   :  { %v649_v15 = vpack.c.bf16 %v2407_v24, %v2407_v24 }
 0x23e   :  { %1633 = vmatmul.msk.bf16.vlgmr.msrb.gmra.mxu1 %vm321_vm1, %v649_v15  ;;  %1634 = vmatmul.msk.bf16.vlgmr.msra.gmra.mxu2 %vm321_vm1, %v649_v15 }
 0x23f   :  { %1635 = vmatmul.msk.bf16.vlgmr.msra.gmra.mxu3 %vm321_vm1, %v649_v15  ;;  %839 = vmatpush.bf16.msrb.mxu1 %v2277_v42 }
 0x240   :  { %852 = vmatpush.bf16.msra.mxu2 %v2284_v43  ;;  %865 = vmatpush.bf16.msra.mxu3 %v2290_v46 }
 0x243   :  { %840 = vmatpush.bf16.msrb.mxu1 %v2299_v54 }
 0x244   :  { %853 = vmatpush.bf16.msra.mxu2 %v2306_v55  ;;  %866 = vmatpush.bf16.msra.mxu3 %v2321_v63 }
 0x2bb   :  { %v662_v13 = vpop.f32.mrf.mxu1 }
 0x2bc   :  { %v692_v18 = vadd.f32 %v662_v13, %v2355_v25 }
 0x2be   :  { %v1636_v27 = vmul.f32 -1.442695, %v692_v18 }
 0x2c0   :  { %1802 = vpow2.f32 %v1636_v27 }
 0x2c1   :  { %v675_v29 = vpop.f32.mrf.mxu2 }
 0x2c2   :  { %v712_v30 = vadd.f32 %v675_v29, %v2357_v26  ;;  %v688_v33 = vpop.f32.mrf.mxu3 }
 0x2c3   :  { %v664_v16 = vpop.f32.mrf.mxu1  ;;  %v689_v5 = vadd.f32 %v2401_v35, %v688_v33 }
 0x2c4   :  { %v1637_v21 = vmul.f32 -1.442695, %v712_v30 }
 0x2c6   :  { %v1803_v17 = vpop.eup %1802  ;;  %1804 = vpow2.f32 %v1637_v21 }
 0x2c7   :  { %v696_v22 = vadd.f32 1.0, %v1803_v17 }
 0x2c9   :  { %1806 = vrcp.f32 %v696_v22  ;;  %v677_v36 = vpop.f32.mrf.mxu2  ;;  %v708_v51 = vand.u32 2147483648, %v696_v22  ;;  %v706_v58 = vand.u32 2147483647, %v696_v22  ;;  %vm702_vm11 = vweird.f32 %v696_v22 }
 0x2ca   :  { %v690_v39 = vpop.f32.mrf.mxu3 }
 0x2cb   :  { %v709_v1 = vor.u32 1.1754944e-38, %v708_v51  ;;  %vm707_vm13 = vcmp.eq.f32.partialorder %v706_v58, 8.507059e+37 }
 0x2cc   :  { %v1805_v41 = vpop.eup %1804 }
 0x2cd   :  { %v716_v44 = vadd.f32 1.0, %v1805_v41 }
 0x2cf   :  { %v1807_v48 = vpop.eup %1806  ;;  %1808 = vrcp.f32 %v716_v44  ;;  %v728_v9 = vand.u32 2147483648, %v716_v44  ;;  %v726_v11 = vand.u32 2147483647, %v716_v44  ;;  %vm722_vm15 = vweird.f32 %v716_v44 }
 0x2d0   :  { %v698_v50 = vmul.f32 %v1807_v48, %v696_v22  ;;  %vm703_vm10 = vweird.f32 %v1807_v48 }
 0x2d1   :  { %vm704_vm12 = vmor %vm702_vm11, %vm703_vm10  ;;  %v729_v19 = vor.u32 1.1754944e-38, %v728_v9  ;;  %vm727_vm2 = vcmp.eq.f32.partialorder %v726_v11, 8.507059e+37 }
 0x2d2   :  { %v699_v25 = vsub.f32 1.0, %v698_v50 }
 0x2d4   :  { %v700_v56 = vmul.f32 %v1807_v48, %v699_v25 }
 0x2d5   :  { %v1809_v26 = vpop.eup %1808 }
 0x2d6   :  { %v718_v59 = vmul.f32 %v1809_v26, %v716_v44  ;;  %v701_v62 = vadd.f32 %v1807_v48, %v700_v56  ;;  %vm723_vm14 = vweird.f32 %v1809_v26 }
 0x2d7   :  { %vm724_vm0 = vmor %vm722_vm15, %vm723_vm14 }
 0x2d8   :  { %v719_v2 = vsub.f32 1.0, %v718_v59  ;;  %v705_v6 = vsel %vm704_vm12, %v1807_v48, %v701_v62 }
 0x2d9   :  { %v710_v7 = vsel %vm707_vm13, %v709_v1, %v705_v6 }
 0x2da   :  { %v720_v8 = vmul.f32 %v1809_v26, %v719_v2  ;;  %v732_v10 = vmul.f32 %v710_v7, %v689_v5 }
 0x2dc   :  { %v721_v12 = vadd.f32 %v1809_v26, %v720_v8  ;;  %v733_v14 = vadd.f32 %v732_v10, %v2353_v20 }
 0x2de   :  { %v725_v23 = vsel %vm724_vm0, %v1809_v26, %v721_v12  ;;  %1810 = vtanh.f32 %v733_v14 }
 0x2df   :  { %v730_v15 = vsel %vm727_vm2, %v729_v19, %v725_v23 }
 0x2e0   :  { %v735_v13 = vsub.f32 1.0, %v730_v15  ;;  %v737_v29 = vmul.f32 %v730_v15, %v2407_v24 }
 0x2e4   :  { %v1811_v18 = vpop.eup %1810 }
 0x2e5   :  { %v736_v27 = vmul.f32 %v1811_v18, %v735_v13 }
 0x2e7   :  { %v2425_v30 = vadd.f32 %v737_v29, %v736_v27 }
 0x2e9   :  { %v739_v33 = vpack.c.bf16 %v2425_v30, %v2425_v30 }
 0x2eb   :  { %1638 = vmatmul.msk.bf16.vlgmr.msra.gmra.mxu1 %vm321_vm1, %v739_v33  ;;  %1639 = vmatmul.msk.bf16.vlgmr.msrb.gmra.mxu2 %vm321_vm1, %v739_v33 }
 0x2ec   :  { %1640 = vmatmul.msk.bf16.vlgmr.msrb.gmra.mxu3 %vm321_vm1, %v739_v33  ;;  %942 = vmatpush.bf16.msra.mxu1 %v2284_v43 }
 0x2ed   :  { %955 = vmatpush.bf16.msrb.mxu2 %v2290_v46  ;;  %1019 = vmatpush.bf16.msrb.mxu3 %v2277_v42 }
 0x2f0   :  { %943 = vmatpush.bf16.msra.mxu1 %v2306_v55 }
 0x2f1   :  { %956 = vmatpush.bf16.msrb.mxu2 %v2321_v63  ;;  %1020 = vmatpush.bf16.msrb.mxu3 %v2299_v54 }
 0x368   :  { %v752_v20 = vpop.f32.mrf.mxu1 }
 0x369   :  { %v782_v24 = vadd.f32 %v752_v20, %v2362_v31 }
 0x36b   :  { %v1641_v16 = vmul.f32 -1.442695, %v782_v24 }
 0x36d   :  { %1812 = vpow2.f32 %v1641_v16 }
 0x36e   :  { %v765_v21 = vpop.f32.mrf.mxu2 }
 0x36f   :  { %v802_v17 = vadd.f32 %v765_v21, %v2364_v32  ;;  %v778_v22 = vpop.f32.mrf.mxu3 }
 0x370   :  { %v754_v36 = vpop.f32.mrf.mxu1  ;;  %v779_v7 = vadd.f32 %v2401_v35, %v778_v22 }
 0x371   :  { %v1642_v39 = vmul.f32 -1.442695, %v802_v17 }
 0x373   :  { %v1813_v41 = vpop.eup %1812  ;;  %1814 = vpow2.f32 %v1642_v39 }
 0x374   :  { %v786_v44 = vadd.f32 1.0, %v1813_v41 }
 0x376   :  { %1816 = vrcp.f32 %v786_v44  ;;  %v767_v48 = vpop.f32.mrf.mxu2  ;;  %v798_v26 = vand.u32 2147483648, %v786_v44  ;;  %v796_v62 = vand.u32 2147483647, %v786_v44  ;;  %vm792_vm4 = vweird.f32 %v786_v44 }
 0x377   :  { %v780_v50 = vpop.f32.mrf.mxu3 }
 0x378   :  { %v799_v5 = vor.u32 1.1754944e-38, %v798_v26  ;;  %vm797_vm6 = vcmp.eq.f32.partialorder %v796_v62, 8.507059e+37 }
 0x379   :  { %v1815_v25 = vpop.eup %1814 }
 0x37a   :  { %v806_v51 = vadd.f32 1.0, %v1815_v25 }
 0x37c   :  { %v1817_v56 = vpop.eup %1816  ;;  %1818 = vrcp.f32 %v806_v51  ;;  %v818_v11 = vand.u32 2147483648, %v806_v51  ;;  %v816_v14 = vand.u32 2147483647, %v806_v51  ;;  %vm812_vm8 = vweird.f32 %v806_v51 }
 0x37d   :  { %v788_v58 = vmul.f32 %v1817_v56, %v786_v44  ;;  %vm793_vm3 = vweird.f32 %v1817_v56 }
 0x37e   :  { %vm794_vm5 = vmor %vm792_vm4, %vm793_vm3  ;;  %v819_v15 = vor.u32 1.1754944e-38, %v818_v11  ;;  %vm817_vm10 = vcmp.eq.f32.partialorder %v816_v14, 8.507059e+37 }
 0x37f   :  { %v789_v31 = vsub.f32 1.0, %v788_v58 }
 0x381   :  { %v790_v59 = vmul.f32 %v1817_v56, %v789_v31 }
 0x382   :  { %v1819_v32 = vpop.eup %1818 }
 0x383   :  { %v808_v1 = vmul.f32 %v1819_v32, %v806_v51  ;;  %v791_v2 = vadd.f32 %v1817_v56, %v790_v59  ;;  %vm813_vm7 = vweird.f32 %v1819_v32 }
 0x384   :  { %vm814_vm9 = vmor %vm812_vm8, %vm813_vm7 }
 0x385   :  { %v809_v6 = vsub.f32 1.0, %v808_v1  ;;  %v795_v8 = vsel %vm794_vm5, %v1817_v56, %v791_v2 }
 0x386   :  { %v800_v9 = vsel %vm797_vm6, %v799_v5, %v795_v8 }
 0x387   :  { %v810_v10 = vmul.f32 %v1819_v32, %v809_v6  ;;  %v822_v12 = vmul.f32 %v800_v9, %v779_v7 }
 0x389   :  { %v811_v19 = vadd.f32 %v1819_v32, %v810_v10  ;;  %v823_v23 = vadd.f32 %v822_v12, %v2360_v28 }
 0x38b   :  { %v815_v13 = vsel %vm814_vm9, %v1819_v32, %v811_v19  ;;  %1820 = vtanh.f32 %v823_v23 }
 0x38c   :  { %v820_v18 = vsel %vm817_vm10, %v819_v15, %v815_v13 }
 0x38d   :  { %v825_v27 = vsub.f32 1.0, %v820_v18  ;;  %v827_v20 = vmul.f32 %v820_v18, %v2425_v30 }
 0x391   :  { %v1821_v29 = vpop.eup %1820 }
 0x392   :  { %v826_v33 = vmul.f32 %v1821_v29, %v825_v27 }
 0x394   :  { %v2443_v24 = vadd.f32 %v827_v20, %v826_v33 }
 0x396   :  { %v829_v16 = vpack.c.bf16 %v2443_v24, %v2443_v24 }
 0x398   :  { %1643 = vmatmul.msk.bf16.vlgmr.msrb.gmra.mxu1 %vm321_vm1, %v829_v16  ;;  %1644 = vmatmul.msk.bf16.vlgmr.msra.gmra.mxu2 %vm321_vm1, %v829_v16 }
 0x399   :  { %1645 = vmatmul.msk.bf16.vlgmr.msra.gmra.mxu3 %vm321_vm1, %v829_v16  ;;  %1045 = vmatpush.bf16.msrb.mxu1 %v2290_v46 }
 0x39a   :  { %1109 = vmatpush.bf16.msra.mxu2 %v2277_v42  ;;  %1122 = vmatpush.bf16.msra.mxu3 %v2284_v43 }
 0x39d   :  { %1046 = vmatpush.bf16.msrb.mxu1 %v2321_v63 }
 0x39e   :  { %1110 = vmatpush.bf16.msra.mxu2 %v2299_v54  ;;  %1123 = vmatpush.bf16.msra.mxu3 %v2306_v55 }
 0x415   :  { %v842_v28 = vpop.f32.mrf.mxu1 }
 0x416   :  { %v872_v30 = vadd.f32 %v842_v28, %v2369_v37 }
 0x418   :  { %v1646_v21 = vmul.f32 -1.442695, %v872_v30 }
 0x41a   :  { %1822 = vpow2.f32 %v1646_v21 }
 0x41b   :  { %v855_v17 = vpop.f32.mrf.mxu2 }
 0x41c   :  { %v892_v22 = vadd.f32 %v855_v17, %v2371_v38  ;;  %v868_v36 = vpop.f32.mrf.mxu3 }
 0x41d   :  { %v844_v39 = vpop.f32.mrf.mxu1  ;;  %v869_v6 = vadd.f32 %v2401_v35, %v868_v36 }
 0x41e   :  { %v1647_v41 = vmul.f32 -1.442695, %v892_v22 }
 0x420   :  { %v1823_v44 = vpop.eup %1822  ;;  %1824 = vpow2.f32 %v1647_v41 }
 0x421   :  { %v876_v48 = vadd.f32 1.0, %v1823_v44 }
 0x423   :  { %1826 = vrcp.f32 %v876_v48  ;;  %v857_v50 = vpop.f32.mrf.mxu2  ;;  %v888_v26 = vand.u32 2147483648, %v876_v48  ;;  %v886_v62 = vand.u32 2147483647, %v876_v48  ;;  %vm882_vm12 = vweird.f32 %v876_v48 }
 0x424   :  { %v870_v25 = vpop.f32.mrf.mxu3 }
 0x425   :  { %v889_v2 = vor.u32 1.1754944e-38, %v888_v26  ;;  %vm887_vm14 = vcmp.eq.f32.partialorder %v886_v62, 8.507059e+37 }
 0x426   :  { %v1825_v51 = vpop.eup %1824 }
 0x427   :  { %v896_v56 = vadd.f32 1.0, %v1825_v51 }
 0x429   :  { %v1827_v58 = vpop.eup %1826  ;;  %1828 = vrcp.f32 %v896_v56  ;;  %v908_v10 = vand.u32 2147483648, %v896_v56  ;;  %v906_v12 = vand.u32 2147483647, %v896_v56  ;;  %vm902_vm0 = vweird.f32 %v896_v56 }
 0x42a   :  { %v878_v31 = vmul.f32 %v1827_v58, %v876_v48  ;;  %vm883_vm11 = vweird.f32 %v1827_v58 }
 0x42b   :  { %vm884_vm13 = vmor %vm882_vm12, %vm883_vm11  ;;  %v909_v23 = vor.u32 1.1754944e-38, %v908_v10  ;;  %vm907_vm3 = vcmp.eq.f32.partialorder %v906_v12, 8.507059e+37 }
 0x42c   :  { %v879_v37 = vsub.f32 1.0, %v878_v31 }
 0x42e   :  { %v880_v59 = vmul.f32 %v1827_v58, %v879_v37 }
 0x42f   :  { %v1829_v38 = vpop.eup %1828 }
 0x430   :  { %v898_v32 = vmul.f32 %v1829_v38, %v896_v56  ;;  %v881_v1 = vadd.f32 %v1827_v58, %v880_v59  ;;  %vm903_vm15 = vweird.f32 %v1829_v38 }
 0x431   :  { %vm904_vm2 = vmor %vm902_vm0, %vm903_vm15 }
 0x432   :  { %v899_v5 = vsub.f32 1.0, %v898_v32  ;;  %v885_v7 = vsel %vm884_vm13, %v1827_v58, %v881_v1 }
 0x433   :  { %v890_v8 = vsel %vm887_vm14, %v889_v2, %v885_v7 }
 0x434   :  { %v900_v9 = vmul.f32 %v1829_v38, %v899_v5  ;;  %v912_v11 = vmul.f32 %v890_v8, %v869_v6 }
 0x436   :  { %v901_v14 = vadd.f32 %v1829_v38, %v900_v9  ;;  %v913_v19 = vadd.f32 %v912_v11, %v2367_v34 }
 0x438   :  { %v905_v15 = vsel %vm904_vm2, %v1829_v38, %v901_v14  ;;  %1830 = vtanh.f32 %v913_v19 }
 0x439   :  { %v910_v13 = vsel %vm907_vm3, %v909_v23, %v905_v15 }
 0x43a   :  { %v915_v18 = vsub.f32 1.0, %v910_v13  ;;  %v917_v33 = vmul.f32 %v910_v13, %v2443_v24 }
 0x43e   :  { %v1831_v27 = vpop.eup %1830 }
 0x43f   :  { %v916_v29 = vmul.f32 %v1831_v27, %v915_v18 }
 0x441   :  { %v2461_v20 = vadd.f32 %v917_v33, %v916_v29 }
 0x443   :  { %v919_v16 = vpack.c.bf16 %v2461_v20, %v2461_v20 }
 0x445   :  { %1648 = vmatmul.msk.bf16.vlgmr.msrb.gmra.mxu0 %vm321_vm1, %v919_v16  ;;  %1649 = vmatmul.msk.bf16.vlgmr.msra.gmra.mxu1 %vm321_vm1, %v919_v16 }
 0x446   :  { %1650 = vmatmul.msk.bf16.vlgmr.msrb.gmra.mxu2 %vm321_vm1, %v919_v16  ;;  %1135 = vmatpush.bf16.msrb.mxu0 %v2290_v46 }
 0x447   :  { %1199 = vmatpush.bf16.msra.mxu1 %v2277_v42  ;;  %1212 = vmatpush.bf16.msrb.mxu2 %v2284_v43 }
 0x44a   :  { %1136 = vmatpush.bf16.msrb.mxu0 %v2321_v63 }
 0x44b   :  { %1200 = vmatpush.bf16.msra.mxu1 %v2299_v54  ;;  %1213 = vmatpush.bf16.msrb.mxu2 %v2306_v55 }
 0x4c2   :  { %v932_v34 = vpop.f32.mrf.mxu0  ;;  %v945_v24 = vpop.f32.mrf.mxu1 }
 0x4c3   :  { %v962_v28 = vadd.f32 %v932_v34, %v2376_v45  ;;  %v982_v30 = vadd.f32 %v945_v24, %v2378_v47 }
 0x4c5   :  { %v1651_v21 = vmul.f32 -1.442695, %v962_v28  ;;  %v1652_v17 = vmul.f32 -1.442695, %v982_v30 }
 0x4c7   :  { %1832 = vpow2.f32 %v1651_v21 }
 0x4c8   :  { %1834 = vpow2.f32 %v1652_v17 }
 0x4c9   :  { %v958_v22 = vpop.f32.mrf.mxu2 }
 0x4ca   :  { %v934_v42 = vpop.f32.mrf.mxu0  ;;  %v947_v36 = vpop.f32.mrf.mxu1  ;;  %v959_v59 = vadd.f32 %v2401_v35, %v958_v22 }
 0x4cd   :  { %v1833_v43 = vpop.eup %1832 }
 0x4ce   :  { %v1835_v39 = vpop.eup %1834  ;;  %v966_v41 = vadd.f32 1.0, %v1833_v43 }
 0x4cf   :  { %v986_v44 = vadd.f32 1.0, %v1835_v39 }
 0x4d0   :  { %1836 = vrcp.f32 %v966_v41  ;;  %v978_v51 = vand.u32 2147483648, %v966_v41  ;;  %v976_v58 = vand.u32 2147483647, %v966_v41  ;;  %vm972_vm5 = vweird.f32 %v966_v41 }
 0x4d1   :  { %1838 = vrcp.f32 %v986_v44  ;;  %v960_v54 = vpop.f32.mrf.mxu2  ;;  %v998_v1 = vand.u32 2147483648, %v986_v44  ;;  %vm992_vm9 = vweird.f32 %v986_v44  ;;  %v996_v5 = vand.u32 2147483647, %v986_v44 }
 0x4d2   :  { %v979_v26 = vor.u32 1.1754944e-38, %v978_v51  ;;  %vm977_vm7 = vcmp.eq.f32.partialorder %v976_v58, 8.507059e+37 }
 0x4d3   :  { %v999_v8 = vor.u32 1.1754944e-38, %v998_v1  ;;  %vm997_vm11 = vcmp.eq.f32.partialorder %v996_v5, 8.507059e+37 }
 0x4d6   :  { %v1837_v55 = vpop.eup %1836 }
 0x4d7   :  { %v1839_v48 = vpop.eup %1838  ;;  %v968_v50 = vmul.f32 %v1837_v55, %v966_v41  ;;  %vm973_vm4 = vweird.f32 %v1837_v55 }
 0x4d8   :  { %v988_v45 = vmul.f32 %v1839_v48, %v986_v44  ;;  %vm974_vm6 = vmor %vm972_vm5, %vm973_vm4  ;;  %vm993_vm8 = vweird.f32 %v1839_v48 }
 0x4d9   :  { %v969_v25 = vsub.f32 1.0, %v968_v50  ;;  %vm994_vm10 = vmor %vm992_vm9, %vm993_vm8 }
 0x4da   :  { %v989_v47 = vsub.f32 1.0, %v988_v45 }
 0x4db   :  { %v970_v56 = vmul.f32 %v1837_v55, %v969_v25 }
 0x4dc   :  { %v990_v31 = vmul.f32 %v1839_v48, %v989_v47 }
 0x4dd   :  { %v971_v37 = vadd.f32 %v1837_v55, %v970_v56 }
 0x4de   :  { %v991_v38 = vadd.f32 %v1839_v48, %v990_v31 }
 0x4df   :  { %v975_v62 = vsel %vm974_vm6, %v1837_v55, %v971_v37 }
 0x4e0   :  { %v980_v32 = vsel %vm977_vm7, %v979_v26, %v975_v62  ;;  %v995_v7 = vsel %vm994_vm10, %v1839_v48, %v991_v38 }
 0x4e1   :  { %v1002_v2 = vmul.f32 %v980_v32, %v959_v59  ;;  %v1000_v9 = vsel %vm997_vm11, %v999_v8, %v995_v7 }
 0x4e2   :  { %v1005_v10 = vsub.f32 1.0, %v1000_v9  ;;  %v1007_v14 = vmul.f32 %v1000_v9, %v2461_v20 }
 0x4e3   :  { %v1003_v6 = vadd.f32 %v1002_v2, %v2374_v40 }
 0x4e5   :  { %1840 = vtanh.f32 %v1003_v6 }
 0x4eb   :  { %v1841_v11 = vpop.eup %1840 }
 0x4ec   :  { %v1006_v12 = vmul.f32 %v1841_v11, %v1005_v10 }
 0x4ee   :  { %v1008_v19 = vadd.f32 %v1007_v14, %v1006_v12 }
 0x4f0   :  { %v1009_v23 = vpack.c.bf16 %v1008_v19, %v1008_v19 }
 0x4f2   :  { %1653 = vmatmul.msk.bf16.vlgmr.msrb.gmra.mxu3 %vm321_vm1, %v1009_v23  ;;  %1654 = vmatmul.msk.bf16.vlgmr.msra.gmra.mxu0 %vm321_vm1, %v1009_v23 }
 0x4f3   :  { %1655 = vmatmul.msk.bf16.vlgmr.msrb.gmra.mxu1 %vm321_vm1, %v1009_v23  ;;  %1225 = vmatpush.bf16.msrb.mxu3 %v2290_v46 }
 0x4f7   :  { %1226 = vmatpush.bf16.msrb.mxu3 %v2321_v63 }
 0x56f   :  { %v1035_v40 = vpop.f32.mrf.mxu0 }
 0x570   :  { %v1072_v15 = vadd.f32 %v1035_v40, %v2385_v53  ;;  %v1048_v13 = vpop.f32.mrf.mxu1 }
 0x571   :  { %v1049_v54 = vadd.f32 %v2401_v35, %v1048_v13 }
 0x572   :  { %v1657_v18 = vmul.f32 -1.442695, %v1072_v15 }
 0x574   :  { %1842 = vpow2.f32 %v1657_v18 }
 0x575   :  { %v1022_v27 = vpop.f32.mrf.mxu3 }
 0x576   :  { %v1052_v29 = vadd.f32 %v1022_v27, %v2383_v52 }
 0x577   :  { %v1037_v33 = vpop.f32.mrf.mxu0 }
 0x578   :  { %v1656_v20 = vmul.f32 -1.442695, %v1052_v29  ;;  %v1050_v16 = vpop.f32.mrf.mxu1 }
 0x57a   :  { %v1843_v34 = vpop.eup %1842  ;;  %1844 = vpow2.f32 %v1656_v20 }
 0x57b   :  { %v1076_v24 = vadd.f32 1.0, %v1843_v34 }
 0x57d   :  { %v1024_v28 = vpop.f32.mrf.mxu3  ;;  %1846 = vrcp.f32 %v1076_v24  ;;  %v1088_v45 = vand.u32 2147483648, %v1076_v24  ;;  %vm1082_vm2 = vweird.f32 %v1076_v24  ;;  %v1086_v47 = vand.u32 2147483647, %v1076_v24 }
 0x57f   :  { %v1089_v58 = vor.u32 1.1754944e-38, %v1088_v45  ;;  %vm1087_vm4 = vcmp.eq.f32.partialorder %v1086_v47, 8.507059e+37 }
 0x580   :  { %v1845_v46 = vpop.eup %1844 }
 0x581   :  { %v1056_v30 = vadd.f32 1.0, %v1845_v46 }
 0x583   :  { %1848 = vrcp.f32 %v1056_v30  ;;  %v1847_v63 = vpop.eup %1846  ;;  %v1068_v36 = vand.u32 2147483648, %v1056_v30  ;;  %v1066_v52 = vand.u32 2147483647, %v1056_v30  ;;  %vm1062_vm13 = vweird.f32 %v1056_v30 }
 0x584   :  { %v1078_v21 = vmul.f32 %v1847_v63, %v1076_v24  ;;  %vm1083_vm0 = vweird.f32 %v1847_v63 }
 0x585   :  { %v1069_v44 = vor.u32 1.1754944e-38, %v1068_v36  ;;  %vm1067_vm15 = vcmp.eq.f32.partialorder %v1066_v52, 8.507059e+37  ;;  %vm1084_vm3 = vmor %vm1082_vm2, %vm1083_vm0 }
 0x586   :  { %v1079_v22 = vsub.f32 1.0, %v1078_v21 }
 0x588   :  { %v1080_v39 = vmul.f32 %v1847_v63, %v1079_v22 }
 0x589   :  { %v1849_v53 = vpop.eup %1848 }
 0x58a   :  { %v1058_v17 = vmul.f32 %v1849_v53, %v1056_v30  ;;  %vm1063_vm12 = vweird.f32 %v1849_v53  ;;  %v1081_v48 = vadd.f32 %v1847_v63, %v1080_v39 }
 0x58b   :  { %vm1064_vm14 = vmor %vm1062_vm13, %vm1063_vm12 }
 0x58c   :  { %v1059_v42 = vsub.f32 1.0, %v1058_v17  ;;  %v1085_v56 = vsel %vm1084_vm3, %v1847_v63, %v1081_v48 }
 0x58d   :  { %v1090_v31 = vsel %vm1087_vm4, %v1089_v58, %v1085_v56 }
 0x58e   :  { %v1060_v43 = vmul.f32 %v1849_v53, %v1059_v42  ;;  %v1095_v37 = vsub.f32 1.0, %v1090_v31  ;;  %v1097_v62 = vmul.f32 %v1090_v31, %v1008_v19 }
 0x590   :  { %v1061_v41 = vadd.f32 %v1849_v53, %v1060_v43 }
 0x592   :  { %v1065_v55 = vsel %vm1064_vm14, %v1849_v53, %v1061_v41 }
 0x593   :  { %v1070_v50 = vsel %vm1067_vm15, %v1069_v44, %v1065_v55 }
 0x594   :  { %v1092_v25 = vmul.f32 %v1070_v50, %v1049_v54 }
 0x596   :  { %v1093_v51 = vadd.f32 %v1092_v25, %v2381_v49 }
 0x598   :  { %1850 = vtanh.f32 %v1093_v51  ;;  %v1756_v51 = vld [vmem:[%s2588_s16 + $0x8] sm:$0xff] }
 0x599   :  { %1309 = vmatpush.bf16.msra.mxu0 %v1756_v51  ;;  %v1790_v51 = vld [vmem:[%s2593_s21] ss:$0 sm:$0xff]  ;;  %s2087_s21 = smov [#allocation14]  }
 0x59a   :  { %s1517_s25 = sshll.u32 %s2087_s21, 4  ;;  %s1518_s25 = int_to_ptr.vmem [resolvable:$true] %s1517_s25 }
 0x59e   :  { %v1851_v26 = vpop.eup %1850 }
 0x59f   :  { %v1096_v59 = vmul.f32 %v1851_v26, %v1095_v37 }
 0x5a1   :  { %v1098_v38 = vadd.f32 %v1097_v62, %v1096_v59 }
 0x5a3   :  { %v1099_v32 = vpack.c.bf16 %v1098_v38, %v1098_v38 }
 0x5a5   :  { %1658 = vmatmul.msk.bf16.vlgmr.msra.gmra.mxu2 %vm321_vm1, %v1099_v32  ;;  %1659 = vmatmul.msk.bf16.vlgmr.msra.gmra.mxu3 %vm321_vm1, %v1099_v32 }
 0x5a6   :  { %1660 = vmatmul.msk.bf16.vlgmr.msrb.gmra.mxu0 %vm321_vm1, %v1099_v32 }
 0x623   :  { %v1138_v1 = vpop.f32.mrf.mxu0 }
 0x624   :  { %v1139_v24 = vadd.f32 %v2401_v35, %v1138_v1 }
 0x628   :  { %v1112_v2 = vpop.f32.mrf.mxu2  ;;  %v1125_v49 = vpop.f32.mrf.mxu3 }
 0x629   :  { %v1142_v5 = vadd.f32 %v1112_v2, %v2390_v60  ;;  %v1162_v6 = vadd.f32 %v1125_v49, %v2392_v61  ;;  %v1762_v2 = vld [vmem:[%s2590_s18 + $0x28] sm:$0xff] }
 0x62b   :  { %v1661_v7 = vmul.f32 -1.442695, %v1142_v5  ;;  %v1662_v8 = vmul.f32 -1.442695, %v1162_v6  ;;  %v1140_v9 = vpop.f32.mrf.mxu0 }
 0x62c   :  { %v1761_v9 = vld [vmem:[%s2590_s18 + $0x20] sm:$0xff] }
 0x62d   :  { %1852 = vpow2.f32 %v1661_v7 }
 0x62e   :  { %1854 = vpow2.f32 %v1662_v8 }
 0x630   :  { %v1114_v10 = vpop.f32.mrf.mxu2  ;;  %v1127_v11 = vpop.f32.mrf.mxu3 }
 0x633   :  { %v1853_v12 = vpop.eup %1852 }
 0x634   :  { %v1855_v14 = vpop.eup %1854  ;;  %v1146_v19 = vadd.f32 1.0, %v1853_v12 }
 0x635   :  { %v1166_v23 = vadd.f32 1.0, %v1855_v14 }
 0x636   :  { %1856 = vrcp.f32 %v1146_v19  ;;  %v1158_v27 = vand.u32 2147483648, %v1146_v19  ;;  %v1156_v33 = vand.u32 2147483647, %v1146_v19  ;;  %vm1152_vm6 = vweird.f32 %v1146_v19 }
 0x637   :  { %1858 = vrcp.f32 %v1166_v23  ;;  %v1178_v21 = vand.u32 2147483648, %v1166_v23  ;;  %vm1172_vm10 = vweird.f32 %v1166_v23  ;;  %v1176_v53 = vand.u32 2147483647, %v1166_v23 }
 0x638   :  { %v1159_v34 = vor.u32 1.1754944e-38, %v1158_v27  ;;  %vm1157_vm8 = vcmp.eq.f32.partialorder %v1156_v33, 8.507059e+37 }
 0x639   :  { %v1179_v42 = vor.u32 1.1754944e-38, %v1178_v21  ;;  %vm1177_vm12 = vcmp.eq.f32.partialorder %v1176_v53, 8.507059e+37  ;;  %v1757_v21 = vld [vmem:[%s2590_s18] sm:$0xff]  ;;  %v1768_v53 = vld [vmem:[%s2592_s20 + $0x18] sm:$0xff] }
 0x63a   :  { %1445 = vmatpush.bf16.msra.mxu2 %v1768_v53 }
 0x63c   :  { %v1857_v40 = vpop.eup %1856 }
 0x63d   :  { %v1859_v15 = vpop.eup %1858  ;;  %v1148_v13 = vmul.f32 %v1857_v40, %v1146_v19  ;;  %vm1153_vm5 = vweird.f32 %v1857_v40 }
 0x63e   :  { %v1168_v18 = vmul.f32 %v1859_v15, %v1166_v23  ;;  %vm1154_vm7 = vmor %vm1152_vm6, %vm1153_vm5  ;;  %vm1173_vm9 = vweird.f32 %v1859_v15  ;;  %vm1437_vm6 = vcmask 523264  }
 0x63f   :  { %v1149_v60 = vsub.f32 1.0, %v1148_v13  ;;  %vm1174_vm11 = vmor %vm1172_vm10, %vm1173_vm9 }
 0x640   :  { %v1169_v61 = vsub.f32 1.0, %v1168_v18 }
 0x641   :  { %v1150_v29 = vmul.f32 %v1857_v40, %v1149_v60 }
 0x642   :  { %v1170_v20 = vmul.f32 %v1859_v15, %v1169_v61 }
 0x643   :  { %v1151_v16 = vadd.f32 %v1857_v40, %v1150_v29 }
 0x644   :  { %v1171_v30 = vadd.f32 %v1859_v15, %v1170_v20 }
 0x645   :  { %v1155_v28 = vsel %vm1154_vm7, %v1857_v40, %v1151_v16 }
 0x646   :  { %v1160_v46 = vsel %vm1157_vm8, %v1159_v34, %v1155_v28  ;;  %v1175_v22 = vsel %vm1174_vm11, %v1859_v15, %v1171_v30  ;;  %v1760_v15 = vld [vmem:[%s2590_s18 + $0x18] sm:$0xff] }
 0x647   :  { %v1182_v63 = vmul.f32 %v1160_v46, %v1139_v24  ;;  %v1180_v36 = vsel %vm1177_vm12, %v1179_v42, %v1175_v22  ;;  %v1766_v22 = vld [vmem:[%s2592_s20 + $0x8] sm:$0xff]  ;;  %v1788_v42 = vld [vmem:[%s2589_s17] ss:$0 sm:$0xff] }
 0x648   :  { %v1185_v43 = vsub.f32 1.0, %v1180_v36  ;;  %v1187_v41 = vmul.f32 %v1180_v36, %v1098_v38  ;;  %v1763_v38 = vld [vmem:[%s2590_s18 + $0x30] sm:$0xff] }
 0x649   :  { %v1183_v17 = vadd.f32 %v1182_v63, %v2388_v57 }
 0x64b   :  { %1860 = vtanh.f32 %v1183_v17  ;;  %v1767_v17 = vld [vmem:[%s2592_s20 + $0x10] sm:$0xff] }
 0x64c   :  { %1446 = vmatpush.bf16.msra.mxu2 %v1767_v17 }
 0x650   :  { %1447 = vmatpush.bf16.msra.mxu2 %v1766_v22 }
 0x651   :  { %v1861_v52 = vpop.eup %1860 }
 0x652   :  { %v1186_v39 = vmul.f32 %v1861_v52, %v1185_v43 }
 0x654   :  { %v2495_v44 = vadd.f32 %v1187_v41, %v1186_v39 }
 0x656   :  { %v1189_v54 = vpack.c.bf16 %v2495_v44, %v2495_v44 }
 0x658   :  { %1663 = vmatmul.msk.bf16.vlgmr.msra.gmra.mxu1 %vm321_vm1, %v1189_v54  ;;  %1664 = vmatmul.msk.bf16.vlgmr.msrb.gmra.mxu2 %vm321_vm1, %v1189_v54 }
 0x659   :  { %1665 = vmatmul.msk.bf16.vlgmr.msrb.gmra.mxu3 %vm321_vm1, %v1189_v54  ;;  %v1770_v54 = vld [vmem:[%s2594_s22 + $0x8] sm:$0xff] }
 0x65a   :  { %1485 = vmatpush.bf16.msra.mxu3 %v1770_v54 }
 0x6d5   :  { %v1202_v57 = vpop.f32.mrf.mxu1 }
 0x6d6   :  { %v1232_v55 = vadd.f32 %v1202_v57, %v2397_v3  ;;  %v1755_v3 = vld [vmem:[%s2588_s16] sm:$0xff] }
 0x6d7   :  { %1310 = vmatpush.bf16.msra.mxu0 %v1755_v3  ;;  %v1769_v57 = vld [vmem:[%s2594_s22] sm:$0xff] }
 0x6d8   :  { %v1666_v48 = vmul.f32 -1.442695, %v1232_v55  ;;  %1486 = vmatpush.bf16.msra.mxu3 %v1769_v57  ;;  %v1789_v55 = vld [vmem:[%s2591_s19] ss:$0 sm:$0xff] }
 0x6da   :  { %1862 = vpow2.f32 %v1666_v48 }
 0x6db   :  { %v1215_v50 = vpop.f32.mrf.mxu2 }
 0x6dc   :  { %v1252_v45 = vadd.f32 %v1215_v50, %v2399_v4  ;;  %v1228_v25 = vpop.f32.mrf.mxu3  ;;  %v1764_v4 = vld [vmem:[%s2590_s18 + $0x38] sm:$0xff] }
 0x6dd   :  { %v1204_v47 = vpop.f32.mrf.mxu1  ;;  %1386 = vmatpush.bf16.msrb.mxu1 %v1764_v4  ;;  %v1229_v19 = vadd.f32 %v2401_v35, %v1228_v25  ;;  %v1759_v35 = vld [vmem:[%s2590_s18 + $0x10] sm:$0xff] }
 0x6de   :  { %v1667_v56 = vmul.f32 -1.442695, %v1252_v45 }
 0x6e0   :  { %v1863_v58 = vpop.eup %1862  ;;  %1864 = vpow2.f32 %v1667_v56 }
 0x6e1   :  { %v1236_v31 = vadd.f32 1.0, %v1863_v58  ;;  %1387 = vmatpush.bf16.msrb.mxu1 %v1763_v38 }
 0x6e3   :  { %1866 = vrcp.f32 %v1236_v31  ;;  %v1217_v37 = vpop.f32.mrf.mxu2  ;;  %v1248_v5 = vand.u32 2147483648, %v1236_v31  ;;  %v1246_v7 = vand.u32 2147483647, %v1236_v31  ;;  %vm1242_vm14 = vweird.f32 %v1236_v31 }
 0x6e4   :  { %v1230_v26 = vpop.f32.mrf.mxu3 }
 0x6e5   :  { %1388 = vmatpush.bf16.msrb.mxu1 %v1762_v2  ;;  %v1249_v12 = vor.u32 1.1754944e-38, %v1248_v5  ;;  %vm1247_vm0 = vcmp.eq.f32.partialorder %v1246_v7, 8.507059e+37  ;;  %v1791_v26 = vld [vmem:[%s2622_s30] ss:$0 sm:$0xff] }
 0x6e6   :  { %v1865_v59 = vpop.eup %1864 }
 0x6e7   :  { %v1256_v62 = vadd.f32 1.0, %v1865_v59 }
 0x6e9   :  { %v1867_v32 = vpop.eup %1866  ;;  %1868 = vrcp.f32 %v1256_v62  ;;  %1389 = vmatpush.bf16.msrb.mxu1 %v1761_v9  ;;  %v1268_v18 = vand.u32 2147483648, %v1256_v62  ;;  %v1266_v27 = vand.u32 2147483647, %v1256_v62  ;;  %vm1262_vm3 = vweird.f32 %v1256_v62 }
 0x6ea   :  { %v1238_v1 = vmul.f32 %v1867_v32, %v1236_v31  ;;  %vm1243_vm13 = vweird.f32 %v1867_v32 }
 0x6eb   :  { %vm1244_vm15 = vmor %vm1242_vm14, %vm1243_vm13  ;;  %v1269_v33 = vor.u32 1.1754944e-38, %v1268_v18  ;;  %vm1267_vm5 = vcmp.eq.f32.partialorder %v1266_v27, 8.507059e+37 }
 0x6ec   :  { %v1239_v49 = vsub.f32 1.0, %v1238_v1 }
 0x6ed   :  { %1390 = vmatpush.bf16.msrb.mxu1 %v1760_v15 }
 0x6ee   :  { %v1240_v6 = vmul.f32 %v1867_v32, %v1239_v49 }
 0x6ef   :  { %v1869_v8 = vpop.eup %1868 }
 0x6f0   :  { %v1258_v10 = vmul.f32 %v1869_v8, %v1256_v62  ;;  %v1241_v11 = vadd.f32 %v1867_v32, %v1240_v6  ;;  %vm1263_vm2 = vweird.f32 %v1869_v8 }
 0x6f1   :  { %vm1264_vm4 = vmor %vm1262_vm3, %vm1263_vm2  ;;  %1391 = vmatpush.bf16.msrb.mxu1 %v1759_v35 }
 0x6f2   :  { %v1259_v14 = vsub.f32 1.0, %v1258_v10  ;;  %v1245_v23 = vsel %vm1244_vm15, %v1867_v32, %v1241_v11 }
 0x6f3   :  { %v1250_v40 = vsel %vm1247_vm0, %v1249_v12, %v1245_v23 }
 0x6f4   :  { %v1260_v13 = vmul.f32 %v1869_v8, %v1259_v14  ;;  %v1272_v60 = vmul.f32 %v1250_v40, %v1229_v19 }
 0x6f6   :  { %v1261_v61 = vadd.f32 %v1869_v8, %v1260_v13  ;;  %v1273_v29 = vadd.f32 %v1272_v60, %v2395_v0  ;;  %v1758_v0 = vld [vmem:[%s2590_s18 + $0x8] sm:$0xff] }
 0x6f7   :  { %1392 = vmatpush.bf16.msrb.mxu1 %v1758_v0 }
 0x6f8   :  { %v1265_v20 = vsel %vm1264_vm4, %v1869_v8, %v1261_v61  ;;  %1870 = vtanh.f32 %v1273_v29 }
 0x6f9   :  { %v1270_v16 = vsel %vm1267_vm5, %v1269_v33, %v1265_v20 }
 0x6fa   :  { %v1275_v34 = vsub.f32 1.0, %v1270_v16  ;;  %v1277_v46 = vmul.f32 %v1270_v16, %v2495_v44  ;;  %v1765_v44 = vld [vmem:[%s2592_s20] sm:$0xff] }
 0x6fb   :  { %1393 = vmatpush.bf16.msrb.mxu1 %v1757_v21  ;;  %1448 = vmatpush.bf16.msra.mxu2 %v1765_v44 }
 0x6fe   :  { %v1871_v24 = vpop.eup %1870 }
 0x6ff   :  { %v1276_v28 = vmul.f32 %v1871_v24, %v1275_v34 }
 0x701   :  { %v1278_v30 = vadd.f32 %v1277_v46, %v1276_v28 }
 0x703   :  { %v1279_v63 = vpack.c.bf16 %v1278_v30, %v1278_v30 }
 0x705   :  { %1676 = vmatmul.msk.bf16.vlgmr.msra.gmra.mxu0 %vm321_vm1, %v1279_v63 }
 0x782   :  { %v1312_v36 = vpop.f32.mrf.mxu0 }
 0x783   :  { %v1313_v43 = vadd.f32 %v1788_v42, %v1312_v36 }
 0x785   :  { %v1316_v52 = vmax.f32 %v1313_v43, 0.0 }
 0x787   :  { %v1317_v39 = vpack.c.bf16 %v1316_v52, %v1316_v52 }
 0x789   :  { %1394 = vmatmul.bf16.vlgmr.msrb.gmra.mxu1 %v1317_v39 }
 0x78a   :  { %v1314_v41 = vpop.f32.mrf.mxu0 }
 0x806   :  { %v1395_v48 = vpop.f32.mrf.mxu1 }
 0x807   :  { %v1396_v50 = vadd.f32 %v1789_v55, %v1395_v48 }
 0x809   :  { %v1399_v45 = vmax.f32 %v1396_v50, 0.0 }
 0x80b   :  { %v1400_v25 = vpack.c.bf16 %v1399_v45, %v1399_v45 }
 0x80d   :  { %1725 = vmatmul.msk.bf16.vlgmr.msra.gmra.mxu2 %vm1437_vm6, %v1400_v25 }
 0x80e   :  { %v1397_v47 = vpop.f32.mrf.mxu1 }
 0x890   :  { %v1450_v56 = vpop.f32.mrf.mxu2 }
 0x891   :  { %v1451_v58 = vadd.f32 %v1790_v51, %v1450_v56 }
 0x893   :  { %v1454_v31 = vmax.f32 %v1451_v58, 0.0 }
 0x895   :  { %v1455_v3 = vpack.c.bf16 %v1454_v31, %v1454_v31 }
 0x897   :  { %1734 = vmatmul.msk.bf16.vlgmr.msra.gmra.mxu3 %vm321_vm1, %v1455_v3 }
 0x898   :  { %v1452_v37 = vpop.f32.mrf.mxu2 }
 0x91a   :  { %v1488_v4 = vpop.f32.mrf.mxu3 }
 0x91b   :  { %v1489_v59 = vadd.f32 %v1791_v26, %v1488_v4 }
 0x91d   :  { %v1735_v62 = vmul.f32 -1.442695, %v1489_v59 }
 0x91f   :  { %1872 = vpow2.f32 %v1735_v62 }
 0x922   :  { %v1490_v38 = vpop.f32.mrf.mxu3 }
 0x925   :  { %v1873_v32 = vpop.eup %1872 }
 0x926   :  { %v1495_v1 = vadd.f32 1.0, %v1873_v32 }
 0x928   :  { %1874 = vrcp.f32 %v1495_v1  ;;  %v1507_v6 = vand.u32 2147483648, %v1495_v1  ;;  %v1505_v8 = vand.u32 2147483647, %v1495_v1  ;;  %vm1501_vm1 = vweird.f32 %v1495_v1 }
 0x92a   :  { %v1508_v10 = vor.u32 1.1754944e-38, %v1507_v6  ;;  %vm1506_vm9 = vcmp.eq.f32.partialorder %v1505_v8, 8.507059e+37 }
 0x92e   :  { %v1875_v2 = vpop.eup %1874 }
 0x92f   :  { %v1497_v49 = vmul.f32 %v1875_v2, %v1495_v1  ;;  %vm1502_vm7 = vweird.f32 %v1875_v2 }
 0x930   :  { %vm1503_vm8 = vmor %vm1501_vm1, %vm1502_vm7 }
 0x931   :  { %v1498_v5 = vsub.f32 1.0, %v1497_v49 }
 0x933   :  { %v1499_v7 = vmul.f32 %v1875_v2, %v1498_v5 }
 0x935   :  { %v1500_v9 = vadd.f32 %v1875_v2, %v1499_v7 }
 0x937   :  { %v1504_v11 = vsel %vm1503_vm8, %v1875_v2, %v1500_v9 }
 0x938   :  { %v1509_v12 = vsel %vm1506_vm9, %v1508_v10, %v1504_v11 }
 0x939   :  { %1511 = vst [vmem:[#allocation14] sm:$0xff] %v1509_v12 }
 0x93a   :  { %1522 = dma.vmem_to_hbm [thread:$0]  %s1518_s25, 128, %s1520_s23, [#allocation4]  }
 0x93b   :  { %2076 = dma.done.wait [#allocation4], 128  }
 0x93c   :  { %2077 = vsyncadd [#allocation4], 4294967168 }
 0x93d   :  { %1527 = vsyncpa [#allocation3], 1 }
 0x93e   :  { %1528 = vsyncpa [#allocation6], 1 }
 0x93f   :  { %1529 = vsyncpa [#allocation9], 1 }
 0x940   :  { %1530 = vsyncpa [#allocation12], 1 }
 0x941   :  { %1531 = vsyncpa [#allocation4], 1 }

</bundles_post_ra>
